<compile_context>
chip_gen: v7x
topology: tpu7x:2x2x1
jax: 0.10.0
libtpu: 0.0.40
codegen_flags: <defaults>
</compile_context>

<pallas_src>
import numpy as np

import jax
import jax.numpy as jnp
from jax.experimental import pallas as pl
from jax.experimental.pallas import tpu as pltpu


def _sub8(v):
    return ((v + 7) // 8) * 8


def _lane128(v):
    return ((v + 127) // 128) * 128


def _device_vmem_profile():
    """(max batch tile, VMEM request cap) per TPU generation; conservative default."""
    try:
        kind = jax.devices()[0].device_kind.lower()
    except Exception:
        kind = ""
    if "v6" in kind:
        return 256, 96 << 20          # 128 MiB physical VMEM
    if "v5 lite" in kind or "v5e" in kind:
        return 64, 64 << 20           # raise the 16 MiB default scope; 128 MiB physical
    if "v7" in kind:
        return 128, 48 << 20          # 64 MiB physical per TensorCore
    return 128, 40 << 20


def _pick_nt_chunk(nt, ch_rows):
    """Batch-within-tile chunk so the f32 relu/pool temporaries stay ~3 MiB."""
    row_bytes = _sub8(ch_rows) * 128 * 4
    target = max(1, (3 << 20) // row_bytes)
    best = 1
    for d in range(1, nt + 1):
        if nt % d == 0 and d <= target:
            best = d
    return best


def _est_vmem(nt, ch_rows, cbytes, padded, ntc):
    """Rough per-grid-step VMEM footprint (bytes), incl. double buffering."""
    x_blk = 2 * nt * _sub8(ch_rows) * 128 * cbytes                 # input block
    out_blk = 2 * _sub8(nt) * _lane128(padded) * 4                 # output block
    weights = (_sub8(128) * _lane128(8) * 4                        # pm2 (f32)
               + 2 * _sub8(ch_rows) * 128 * cbytes                 # w1e + w1o
               + 512 * 768 * cbytes                                # w2s
               + _sub8(768) * _lane128(padded) * cbytes            # w3t
               + 3 * 8 * _lane128(768) * 4)                        # biases
    pooled = nt * 8 * _lane128(ch_rows) * 4                        # scratch
    temps = 3 * ntc * _sub8(ch_rows) * 128 * 4                     # relu/pool chunk temps
    inter = (4 * nt * 128 + nt * 512 + 2 * nt * 768 + nt * _lane128(padded)) * 4
    return x_blk + out_blk + 2 * weights + pooled + temps + inter + (4 << 20)


def _pick_tiling(n_pad, ch_rows, cbytes, padded):
    max_tile, cap = _device_vmem_profile()
    budget = int(cap * 0.8)

    cands = []
    for d in range(1, n_pad + 1):
        if n_pad % d:
            continue
        if d != n_pad and d % 8:          # keep the output sublane dim aligned
            continue
        if d > max_tile and d != n_pad:
            continue
        cands.append(d)

    scored = []
    for d in cands:
        ntc = _pick_nt_chunk(d, ch_rows)
        scored.append((d, ntc, _est_vmem(d, ch_rows, cbytes, padded, ntc)))

    fitting = [s for s in scored if s[2] <= budget and s[0] <= max_tile]
    if not fitting:
        best = min(scored, key=lambda s: s[2])
    else:
        best = max(fitting, key=lambda s: s[0])
        # Prefer grid >= 2: pipelines HBM->VMEM and shards across v7x's two TCs.
        if n_pad // best[0] < 2 and n_pad >= 16:
            multi = [s for s in fitting if n_pad // s[0] >= 2 and s[0] >= 8]
            if multi:
                best = max(multi, key=lambda s: s[0])

    n_tile, ntc, est = best
    vmem_limit = int(min(cap, max(est + (8 << 20), 32 << 20)))
    return n_tile, ntc, vmem_limit


def _make_kernel(num_chunks, nt_chunk):
    def kernel(x_ref, pm2_ref, w1e_ref, w1o_ref, b1_ref, w2s_ref, b2_ref,
               w3t_ref, b3_ref, out_ref, pooled_ref):
        nt, ch_rows, _ = x_ref.shape
        k1 = w1e_ref.shape[1]                 # 128
        n_pos = pm2_ref.shape[1] // 2         # 4 pooled positions (2x2)
        cdt = w2s_ref.dtype                   # matmul operand dtype (f32 or bf16)

        # ReLU + AvgPool2d(5, stride=3) as a lane-contracting matmul against the
        # block-diagonal pooling matrix, chunked over the batch-within-tile dim so
        # the f32 temporaries stay small.  pooled_ref[n, parity*4+p, c2] holds the
        # pooled value of channel (2*c2 + parity) at window p.
        def pool_chunk(ci, carry):
            off = ci * nt_chunk
            xs = jnp.maximum(
                x_ref[pl.ds(off, nt_chunk), :, :].astype(jnp.float32), 0.0)
            p2 = jax.lax.dot_general(
                xs, pm2_ref[...],
                dimension_numbers=(((2,), (0,)), ((), ())),
                preferred_element_type=jnp.float32)            # [ntc, C/2, 8]
            pooled_ref[pl.ds(off, nt_chunk), :, :] = jnp.swapaxes(p2, 1, 2)
            return carry

        jax.lax.fori_loop(0, num_chunks, pool_chunk, 0)

        pooled = pooled_ref[...]                               # [nt, 8, C/2] f32

        # Conv2d(C, 128, 1, bias=False) + folded BN1: even/odd channel halves are
        # two K=C/2 matmuls over all 4 pooled positions at once; bias+ReLU once.
        pe = pooled[:, 0:n_pos, :].reshape(nt * n_pos, ch_rows).astype(cdt)
        po = pooled[:, n_pos:2 * n_pos, :].reshape(nt * n_pos, ch_rows).astype(cdt)
        h1 = (jnp.dot(pe, w1e_ref[...], preferred_element_type=jnp.float32)
              + jnp.dot(po, w1o_ref[...], preferred_element_type=jnp.float32))
        h1 = jnp.maximum(h1 + b1_ref[...], 0.0)                # [4*nt, 128]

        # Conv2d(128, 768, 2, bias=False) + folded BN2 as ONE K=512 matmul; the
        # position-major [nt, 512] operand is a plain reshape (rows are already
        # (n, p)-ordered with p minor).
        h1c = h1.reshape(nt, n_pos * k1).astype(cdt)           # [nt, 512]
        h2 = jnp.dot(h1c, w2s_ref[...], preferred_element_type=jnp.float32)
        h2 = jnp.maximum(h2 + b2_ref[...], 0.0)                # [nt, 768]

        # nn.Linear(768, num_classes), lane-padded to 128 for unmasked stores.
        out_ref[...] = (jnp.dot(h2.astype(cdt), w3t_ref[...],
                                preferred_element_type=jnp.float32)
                        + b3_ref[...])

    return kernel


def auxiliary_head_cifar(x, params, *, compute_dtype=jnp.bfloat16):
    """Host-side parameter re-layout / BN folding + one fused pallas_call."""
    n, c_in, hgt, wid = x.shape
    pool_k, pool_s = 5, 3
    p_oh = (hgt - pool_k) // pool_s + 1
    p_ow = (wid - pool_k) // pool_s + 1
    assert (p_oh, p_ow) == (2, 2), "AuxiliaryHeadCIFAR expects an 8x8 feature map"
    hw = hgt * wid
    n_pos = p_oh * p_ow

    w1, w2, w3, b3 = params["w1"], params["w2"], params["w3"], params["b3"]
    k1 = w1.shape[0]                  # 128
    c2 = w2.shape[0]                  # 768
    nc = w3.shape[0]
    assert w2.shape[2:] == (p_oh, p_ow)
    eps = 1e-5
    cbytes = jnp.dtype(compute_dtype).itemsize

    # --- pooling matrix pm[p, h*W+w] = 1/25 inside window p (row-major oh, ow) ---
    pm = np.zeros((n_pos, hw), np.float32)
    for oh_i in range(p_oh):
        for ow_i in range(p_ow):
            p = oh_i * p_ow + ow_i
            for hh in range(oh_i * pool_s, oh_i * pool_s + pool_k):
                for ww in range(ow_i * pool_s, ow_i * pool_s + pool_k):
                    pm[p, hh * wid + ww] = 1.0 / float(pool_k * pool_k)
    # block-diagonal packed pooling matrix (two channels per 128-lane row); kept f32.
    pm2 = np.zeros((2 * hw, 2 * n_pos), np.float32)
    pm2[:hw, :n_pos] = pm.T
    pm2[hw:, n_pos:] = pm.T
    pm2 = jnp.asarray(pm2)

    # --- fold BN1 into conv1 weight (scale) + bias; split even/odd channels ---
    s1 = params["bn1_gamma"] / jnp.sqrt(params["bn1_var"] + eps)
    b1 = (params["bn1_beta"] - params["bn1_mean"] * s1).reshape(1, k1).astype(jnp.float32)
    w1_2d = w1[:, :, 0, 0]                                        # [128, C]
    cp = c_in + (c_in % 2)
    if cp != c_in:
        w1_2d = jnp.pad(w1_2d, ((0, 0), (0, cp - c_in)))
    w1e = (w1_2d[:, 0::2].T * s1[None, :]).astype(compute_dtype)  # [C/2, 128]
    w1o = (w1_2d[:, 1::2].T * s1[None, :]).astype(compute_dtype)
    ch_rows = cp // 2

    # --- fold BN2 into the fused conv2 weight (position-major, k-minor rows) ---
    s2 = params["bn2_gamma"] / jnp.sqrt(params["bn2_var"] + eps)
    b2 = (params["bn2_beta"] - params["bn2_mean"] * s2).reshape(1, c2).astype(jnp.float32)
    w2f = jnp.transpose(w2, (2, 3, 1, 0)).reshape(n_pos * k1, c2)  # [512, 768]
    w2s = (w2f * s2[None, :]).astype(compute_dtype)

    # --- classifier, lane-padded to a multiple of 128 ---
    padded = 128 * pl.cdiv(nc, 128)
    w3t = jnp.zeros((c2, padded), jnp.float32).at[:, :nc].set(w3.T).astype(compute_dtype)
    b3p = jnp.zeros((1, padded), jnp.float32).at[:, :nc].set(b3[None, :])

    # --- lane-dense packed input: [N, C/2, 2*HW] is a free reshape of NCHW ---
    xk = x.astype(compute_dtype)
    if cp != c_in:
        xk = jnp.pad(xk, ((0, 0), (0, cp - c_in), (0, 0), (0, 0)))
    n_pad = n
    if n > 8 and n % 8 != 0:
        n_pad = 8 * pl.cdiv(n, 8)     # keep the output sublane dim tileable
        xk = jnp.pad(xk, ((0, n_pad - n), (0, 0), (0, 0), (0, 0)))
    x2 = xk.reshape(n_pad, ch_rows, 2 * hw)                        # [N, C/2, 128]

    n_tile, nt_chunk, vmem_limit = _pick_tiling(n_pad, ch_rows, cbytes, padded)
    num_chunks = n_tile // nt_chunk
    grid = (n_pad // n_tile,)

    kernel = _make_kernel(num_chunks, nt_chunk)
    full = lambda a: pl.BlockSpec(a.shape, lambda i, _nd=a.ndim: (0,) * _nd)

    out = pl.pallas_call(
        kernel,
        out_shape=jax.ShapeDtypeStruct((n_pad, padded), jnp.float32),
        grid=grid,
        in_specs=[
            pl.BlockSpec((n_tile, ch_rows, 2 * hw), lambda i: (i, 0, 0)),  # x
            full(pm2), full(w1e), full(w1o), full(b1),
            full(w2s), full(b2), full(w3t), full(b3p),
        ],
        out_specs=pl.BlockSpec((n_tile, padded), lambda i: (i, 0)),
        scratch_shapes=[pltpu.VMEM((n_tile, 2 * n_pos, ch_rows), jnp.float32)],
        compiler_params=pltpu.CompilerParams(
            dimension_semantics=("parallel",),
            vmem_limit_bytes=int(vmem_limit)),
    )(x2, pm2, w1e, w1o, b1, w2s, b2, w3t, b3p)

    return out[:n, :nc]


def reference(x, params):
    """Pure-JAX reference of AuxiliaryHeadCIFAR.forward (eval-mode BN)."""
    eps = 1e-5
    k1 = params["w1"].shape[0]
    c2 = params["w2"].shape[0]
    x = jnp.maximum(x, 0.0)
    pooled = jnp.stack(
        [jnp.mean(x[:, :, oh * 3:oh * 3 + 5, ow * 3:ow * 3 + 5], axis=(2, 3))
         for oh in range(2) for ow in range(2)], axis=1)                         # [N, 4, C]
    w1t = params["w1"][:, :, 0, 0].T                                             # [C, 128]
    h1 = jnp.einsum("npc,ck->npk", pooled, w1t)
    h1 = ((h1 - params["bn1_mean"]) / jnp.sqrt(params["bn1_var"] + eps)
          * params["bn1_gamma"] + params["bn1_beta"])
    h1 = jnp.maximum(h1, 0.0)
    w2r = jnp.transpose(params["w2"], (2, 3, 1, 0)).reshape(4, k1, c2)
    h2 = jnp.einsum("npk,pko->no", h1, w2r)
    h2 = ((h2 - params["bn2_mean"]) / jnp.sqrt(params["bn2_var"] + eps)
          * params["bn2_gamma"] + params["bn2_beta"])
    h2 = jnp.maximum(h2, 0.0)
    return h2 @ params["w3"].T + params["b3"]


if __name__ == "__main__":
    N, C, H, W, NUM_CLASSES = 12, 4, 8, 8, 10   # N=12 exercises batch padding + grid=2
    key = jax.random.PRNGKey(0)
    ks = jax.random.split(key, 13)
    x = jax.random.normal(ks[0], (N, C, H, W), jnp.float32)
    params = dict(
        w1=jax.random.normal(ks[1], (128, C, 1, 1), jnp.float32) * 0.1,
        bn1_gamma=1.0 + 0.1 * jax.random.normal(ks[2], (128,), jnp.float32),
        bn1_beta=0.1 * jax.random.normal(ks[3], (128,), jnp.float32),
        bn1_mean=0.1 * jax.random.normal(ks[4], (128,), jnp.float32),
        bn1_var=0.9 + 0.1 * jnp.abs(jax.random.normal(ks[5], (128,), jnp.float32)),
        w2=jax.random.normal(ks[6], (768, 128, 2, 2), jnp.float32) * 0.05,
        bn2_gamma=1.0 + 0.1 * jax.random.normal(ks[7], (768,), jnp.float32),
        bn2_beta=0.1 * jax.random.normal(ks[8], (768,), jnp.float32),
        bn2_mean=0.1 * jax.random.normal(ks[9], (768,), jnp.float32),
        bn2_var=0.9 + 0.1 * jnp.abs(jax.random.normal(ks[10], (768,), jnp.float32)),
        w3=jax.random.normal(ks[11], (NUM_CLASSES, 768), jnp.float32) * 0.05,
        b3=0.1 * jax.random.normal(ks[12], (NUM_CLASSES,), jnp.float32),
    )

    ref = jax.block_until_ready(reference(x, params))

    # Exactness check with f32 matmul operands.
    out_f32 = jax.block_until_ready(
        auxiliary_head_cifar(x, params, compute_dtype=jnp.float32))
    assert out_f32.shape == (N, NUM_CLASSES), out_f32.shape
    assert jnp.allclose(out_f32, ref, atol=1e-4, rtol=1e-4), \
        jnp.max(jnp.abs(out_f32 - ref))

    # bf16 operands / f32 accumulation path (v6e / v7x MXU throughput); pooling
    # matrix and biases stay f32.
    out_bf16 = jax.block_until_ready(
        auxiliary_head_cifar(x, params, compute_dtype=jnp.bfloat16))
    assert out_bf16.shape == (N, NUM_CLASSES), out_bf16.shape
    assert jnp.allclose(out_bf16, ref, atol=5e-2, rtol=5e-2), \
        jnp.max(jnp.abs(out_bf16 - ref))

    print("KERNEL_OK")
</pallas_src>

<mosaic_0001>
module attributes {stable_mosaic.version = 11 : i64} {
  func.func @kernel(%arg0: i32, %arg1: memref<8x2x128xf32, #tpu.memory_space<vmem>>, %arg2: memref<128x8xf32, #tpu.memory_space<vmem>>, %arg3: memref<2x128xf32, #tpu.memory_space<vmem>>, %arg4: memref<2x128xf32, #tpu.memory_space<vmem>>, %arg5: memref<1x128xf32, #tpu.memory_space<vmem>>, %arg6: memref<512x768xf32, #tpu.memory_space<vmem>>, %arg7: memref<1x768xf32, #tpu.memory_space<vmem>>, %arg8: memref<768x128xf32, #tpu.memory_space<vmem>>, %arg9: memref<1x128xf32, #tpu.memory_space<vmem>>, %arg10: memref<8x128xf32, #tpu.memory_space<vmem>>, %arg11: memref<8x8x2xf32, #tpu.memory_space<vmem>>) attributes {dimension_semantics = [#tpu.dimension_semantics<parallel>], iteration_bounds = array<i64: 2>, scalar_prefetch = 0 : i64, scratch_operands = 1 : i64, tpu.core_type = #tpu.core_type<tc>, window_params = [{transform_indices = @transform_0, window_bounds = array<i64: 8, 2, 128>}, {pipeline_mode = #tpu.pipeline_mode<synchronous>, transform_indices = @transform_1, window_bounds = array<i64: 128, 8>}, {pipeline_mode = #tpu.pipeline_mode<synchronous>, transform_indices = @transform_2, window_bounds = array<i64: 2, 128>}, {pipeline_mode = #tpu.pipeline_mode<synchronous>, transform_indices = @transform_3, window_bounds = array<i64: 2, 128>}, {pipeline_mode = #tpu.pipeline_mode<synchronous>, transform_indices = @transform_4, window_bounds = array<i64: 1, 128>}, {pipeline_mode = #tpu.pipeline_mode<synchronous>, transform_indices = @transform_5, window_bounds = array<i64: 512, 768>}, {pipeline_mode = #tpu.pipeline_mode<synchronous>, transform_indices = @transform_6, window_bounds = array<i64: 1, 768>}, {pipeline_mode = #tpu.pipeline_mode<synchronous>, transform_indices = @transform_7, window_bounds = array<i64: 768, 128>}, {pipeline_mode = #tpu.pipeline_mode<synchronous>, transform_indices = @transform_8, window_bounds = array<i64: 1, 128>}, {transform_indices = @transform_9, window_bounds = array<i64: 8, 128>}]} {
    %c0_i32 = arith.constant 0 : i32
    %c8_i32 = arith.constant 8 : i32
    %0 = arith.muli %c0_i32, %c8_i32 : i32
    %1 = arith.index_cast %0 : i32 to index
    %c0 = arith.constant 0 : index
    %c0_0 = arith.constant 0 : index
    %2 = vector.load %arg1[%1, %c0, %c0_0] : memref<8x2x128xf32, #tpu.memory_space<vmem>>, vector<8x2x128xf32>
    %cst = arith.constant 0.000000e+00 : f32
    %3 = vector.broadcast %cst : f32 to vector<8x2x128xf32>
    %4 = arith.maximumf %2, %3 : vector<8x2x128xf32>
    %c0_1 = arith.constant 0 : index
    %c0_2 = arith.constant 0 : index
    %5 = vector.load %arg2[%c0_1, %c0_2] : memref<128x8xf32, #tpu.memory_space<vmem>>, vector<128x8xf32>
    %cst_3 = arith.constant dense<0.000000e+00> : vector<8x2x8xf32>
    %6 = tpu.matmul %4, %5, %cst_3 {dimension_numbers = #tpu.dot_dimension_numbers<[2], [0], [0, 1], [1], [0, 0, 0, 1, 1, 1], [], []>} : vector<8x2x128xf32>, vector<128x8xf32>, vector<8x2x8xf32> -> vector<8x2x8xf32>
    %7 = tpu.transpose %6, [0, 2, 1] : vector<8x2x8xf32> -> vector<8x8x2xf32>
    %8 = arith.index_cast %0 : i32 to index
    %c0_4 = arith.constant 0 : index
    %c0_5 = arith.constant 0 : index
    %9 = vector.load %arg11[%8, %c0_4, %c0_5] : memref<8x8x2xf32, #tpu.memory_space<vmem>>, vector<8x8x2xf32>
    tpu.vector_store %arg11[%8, %c0_4, %c0_5], %7 {strides = array<i32>} : memref<8x8x2xf32, #tpu.memory_space<vmem>>, vector<8x8x2xf32>,
    %c1_i32 = arith.constant 1 : i32
    %c0_6 = arith.constant 0 : index
    %c0_7 = arith.constant 0 : index
    %c0_8 = arith.constant 0 : index
    %10 = vector.load %arg11[%c0_6, %c0_7, %c0_8] : memref<8x8x2xf32, #tpu.memory_space<vmem>>, vector<8x8x2xf32>
    %11 = vector.extract_strided_slice %10 {offsets = [0, 0, 0], sizes = [8, 4, 2], strides = [1, 1, 1]} : vector<8x8x2xf32> to vector<8x4x2xf32>
    %12 = vector.shape_cast %11 : vector<8x4x2xf32> to vector<32x2xf32>
    %13 = vector.extract_strided_slice %10 {offsets = [0, 4, 0], sizes = [8, 4, 2], strides = [1, 1, 1]} : vector<8x8x2xf32> to vector<8x4x2xf32>
    %14 = vector.shape_cast %13 : vector<8x4x2xf32> to vector<32x2xf32>
    %c0_9 = arith.constant 0 : index
    %c0_10 = arith.constant 0 : index
    %15 = vector.load %arg3[%c0_9, %c0_10] : memref<2x128xf32, #tpu.memory_space<vmem>>, vector<2x128xf32>
    %cst_11 = arith.constant dense<0.000000e+00> : vector<32x128xf32>
    %16 = tpu.matmul %12, %15, %cst_11 {dimension_numbers = #tpu.dot_dimension_numbers<[1], [0], [0], [1], [0, 0, 1, 1], [], []>} : vector<32x2xf32>, vector<2x128xf32>, vector<32x128xf32> -> vector<32x128xf32>
    %c0_12 = arith.constant 0 : index
    %c0_13 = arith.constant 0 : index
    %17 = vector.load %arg4[%c0_12, %c0_13] : memref<2x128xf32, #tpu.memory_space<vmem>>, vector<2x128xf32>
    %cst_14 = arith.constant dense<0.000000e+00> : vector<32x128xf32>
    %18 = tpu.matmul %14, %17, %cst_14 {dimension_numbers = #tpu.dot_dimension_numbers<[1], [0], [0], [1], [0, 0, 1, 1], [], []>} : vector<32x2xf32>, vector<2x128xf32>, vector<32x128xf32> -> vector<32x128xf32>
    %19 = arith.addf %16, %18 : vector<32x128xf32>
    %c0_15 = arith.constant 0 : index
    %c0_16 = arith.constant 0 : index
    %20 = vector.load %arg5[%c0_15, %c0_16] : memref<1x128xf32, #tpu.memory_space<vmem>>, vector<1x128xf32>
    %21 = vector.broadcast %20 : vector<1x128xf32> to vector<32x128xf32>
    %22 = arith.addf %19, %21 : vector<32x128xf32>
    %cst_17 = arith.constant 0.000000e+00 : f32
    %23 = vector.broadcast %cst_17 : f32 to vector<32x128xf32>
    %24 = arith.maximumf %22, %23 : vector<32x128xf32>
    %25 = vector.shape_cast %24 : vector<32x128xf32> to vector<8x512xf32>
    %c0_18 = arith.constant 0 : index
    %c0_19 = arith.constant 0 : index
    %26 = vector.load %arg6[%c0_18, %c0_19] : memref<512x768xf32, #tpu.memory_space<vmem>>, vector<512x768xf32>
    %cst_20 = arith.constant dense<0.000000e+00> : vector<8x768xf32>
    %27 = tpu.matmul %25, %26, %cst_20 {dimension_numbers = #tpu.dot_dimension_numbers<[1], [0], [0], [1], [0, 0, 1, 1], [], []>} : vector<8x512xf32>, vector<512x768xf32>, vector<8x768xf32> -> vector<8x768xf32>
    %c0_21 = arith.constant 0 : index
    %c0_22 = arith.constant 0 : index
    %28 = vector.load %arg7[%c0_21, %c0_22] : memref<1x768xf32, #tpu.memory_space<vmem>>, vector<1x768xf32>
    %29 = vector.broadcast %28 : vector<1x768xf32> to vector<8x768xf32>
    %30 = arith.addf %27, %29 : vector<8x768xf32>
    %cst_23 = arith.constant 0.000000e+00 : f32
    %31 = vector.broadcast %cst_23 : f32 to vector<8x768xf32>
    %32 = arith.maximumf %30, %31 : vector<8x768xf32>
    %c0_24 = arith.constant 0 : index
    %c0_25 = arith.constant 0 : index
    %33 = vector.load %arg8[%c0_24, %c0_25] : memref<768x128xf32, #tpu.memory_space<vmem>>, vector<768x128xf32>
    %cst_26 = arith.constant dense<0.000000e+00> : vector<8x128xf32>
    %34 = tpu.matmul %32, %33, %cst_26 {dimension_numbers = #tpu.dot_dimension_numbers<[1], [0], [0], [1], [0, 0, 1, 1], [], []>} : vector<8x768xf32>, vector<768x128xf32>, vector<8x128xf32> -> vector<8x128xf32>
    %c0_27 = arith.constant 0 : index
    %c0_28 = arith.constant 0 : index
    %35 = vector.load %arg9[%c0_27, %c0_28] : memref<1x128xf32, #tpu.memory_space<vmem>>, vector<1x128xf32>
    %36 = vector.broadcast %35 : vector<1x128xf32> to vector<8x128xf32>
    %37 = arith.addf %34, %36 : vector<8x128xf32>
    %c0_29 = arith.constant 0 : index
    %c0_30 = arith.constant 0 : index
    %38 = vector.load %arg10[%c0_29, %c0_30] : memref<8x128xf32, #tpu.memory_space<vmem>>, vector<8x128xf32>
    tpu.vector_store %arg10[%c0_29, %c0_30], %37 {strides = array<i32>} : memref<8x128xf32, #tpu.memory_space<vmem>>, vector<8x128xf32>,
    return
  }
  func.func @transform_0(%arg0: i32) -> (i32, i32, i32) {
    %c0_i32 = arith.constant 0 : i32
    %c0_i32_0 = arith.constant 0 : i32
    %c0_i32_1 = arith.constant 0 : i32
    return %arg0, %c0_i32, %c0_i32_0 : i32, i32, i32
  }
  func.func @transform_1(%arg0: i32) -> (i32, i32) {
    %c0_i32 = arith.constant 0 : i32
    %c0_i32_0 = arith.constant 0 : i32
    %c0_i32_1 = arith.constant 0 : i32
    return %c0_i32, %c0_i32_0 : i32, i32
  }
  func.func @transform_2(%arg0: i32) -> (i32, i32) {
    %c0_i32 = arith.constant 0 : i32
    %c0_i32_0 = arith.constant 0 : i32
    %c0_i32_1 = arith.constant 0 : i32
    return %c0_i32, %c0_i32_0 : i32, i32
  }
  func.func @transform_3(%arg0: i32) -> (i32, i32) {
    %c0_i32 = arith.constant 0 : i32
    %c0_i32_0 = arith.constant 0 : i32
    %c0_i32_1 = arith.constant 0 : i32
    return %c0_i32, %c0_i32_0 : i32, i32
  }
  func.func @transform_4(%arg0: i32) -> (i32, i32) {
    %c0_i32 = arith.constant 0 : i32
    %c0_i32_0 = arith.constant 0 : i32
    %c0_i32_1 = arith.constant 0 : i32
    return %c0_i32, %c0_i32_0 : i32, i32
  }
  func.func @transform_5(%arg0: i32) -> (i32, i32) {
    %c0_i32 = arith.constant 0 : i32
    %c0_i32_0 = arith.constant 0 : i32
    %c0_i32_1 = arith.constant 0 : i32
    return %c0_i32, %c0_i32_0 : i32, i32
  }
  func.func @transform_6(%arg0: i32) -> (i32, i32) {
    %c0_i32 = arith.constant 0 : i32
    %c0_i32_0 = arith.constant 0 : i32
    %c0_i32_1 = arith.constant 0 : i32
    return %c0_i32, %c0_i32_0 : i32, i32
  }
  func.func @transform_7(%arg0: i32) -> (i32, i32) {
    %c0_i32 = arith.constant 0 : i32
    %c0_i32_0 = arith.constant 0 : i32
    %c0_i32_1 = arith.constant 0 : i32
    return %c0_i32, %c0_i32_0 : i32, i32
  }
  func.func @transform_8(%arg0: i32) -> (i32, i32) {
    %c0_i32 = arith.constant 0 : i32
    %c0_i32_0 = arith.constant 0 : i32
    %c0_i32_1 = arith.constant 0 : i32
    return %c0_i32, %c0_i32_0 : i32, i32
  }
  func.func @transform_9(%arg0: i32) -> (i32, i32) {
    %c0_i32 = arith.constant 0 : i32
    %c0_i32_0 = arith.constant 0 : i32
    return %arg0, %c0_i32 : i32, i32
  }
}

</mosaic_0001>

<bundles_post_ra>
// kernel: tpu_custom_call.1
= control target key start
LH: loop header
LB: loop body
LE: loop exit
PB: predicated region body
PF: predicated region fallthrough
CT: control target
= control target key end

     0   :  { %s4275_s0 = inlined_call_operand.hbm [shape: f32[16,2,128], index: 0, kind: input, shape index: {}]   ;;  %s4276_s1 = inlined_call_operand.vmem [shape: f32[128,8], index: 1, kind: input, shape index: {}]   ;;  %s4277_s2 = inlined_call_operand.hbm [shape: f32[2,128], index: 2, kind: input, shape index: {}]   ;;  %s4278_s3 = inlined_call_operand.hbm [shape: f32[2,128], index: 3, kind: input, shape index: {}]   ;;  %s4279_s4 = inlined_call_operand.hbm [shape: f32[1,128], index: 4, kind: input, shape index: {}]   ;;  %s4280_s5 = inlined_call_operand.hbm [shape: f32[512,768], index: 5, kind: input, shape index: {}]   ;;  %s4281_s6 = inlined_call_operand.hbm [shape: f32[1,768], index: 6, kind: input, shape index: {}]   ;;  %s4282_s7 = inlined_call_operand.hbm [shape: f32[768,128], index: 7, kind: input, shape index: {}]   ;;  %s4283_s8 = inlined_call_operand.hbm [shape: f32[1,128], index: 8, kind: input, shape index: {}]   ;;  %s4284_s9 = inlined_call_operand.hbm [shape: f32[16,128], index: 9, kind: output, shape index: {}]  }
   0x1   :  { %4288 = sst [smem:[#allocation24_spill]] %s4277_s2 }
   0x2   :  { %14 = vsyncpa [#allocation4], 0 }
   0x3   :  { %16 = vsyncpa [#allocation4 + $0x1], 0 }
   0x4   :  { %17 = vsyncpa [#allocation7], 0 }
   0x5   :  { %18 = vsyncpa [#allocation10], 0 }
   0x6   :  { %19 = vsyncpa [#allocation13], 0 }
   0x7   :  { %20 = vsyncpa [#allocation16], 0 }
   0x8   :  { %21 = vsyncpa [#allocation5], 0 }
   0x9   :  { %23 = vsyncpa [#allocation5 + $0x1], 0  ;;  %s3802_s30 = smov 0   ;;  %s3804_s10 = smov 0  }
   0xa   :  { %s3806_s11 = smov 0   ;;  %s3808_s12 = smov 0  }
   0xb LB: > { %s3735_s13 = smov [#allocation6]   ;;  %s3823_s15 = sadd.s32 4294967295, %s3733_s12   ;;  %s3733_s12 = sphi %s3808_s12, %s4313_s12   ;;  %s3729_s11 = sphi %s3806_s11, %s4312_s11   ;;  %s3725_s10 = sphi %s3804_s10, %s4311_s10   ;;  %s3721_s30 = sphi %s3802_s30, %s4310_s30  }
   0xc   : > { %s270_s14 = sshll.u32 %s3735_s13, 4  ;;  %p2532_p0 = scmp.ge.s32.totalorder %s3733_s12, 1  ;;  %s3828_s14 = int_to_ptr.vmem [resolvable:$true] %s270_s14 }
   0xd   : > { %p4285_p1 = scmp.eq.s32.totalorder %s3823_s15, 0  ;;  %p254_p2 = scmp.lt.s32.totalorder %s3733_s12, 3 }
   0xe   : > { %s3736_s17 = smov [#allocation9]   ;;  %s3737_s19 = smov [#allocation12]  }
   0xf   : > { %p3830_p3 = pnand %p2532_p0, %p254_p2  ;;  %s292_s18 = sshll.u32 %s3736_s17, 4  ;;  %s3837_s18 = int_to_ptr.vmem [resolvable:$true] %s292_s18 }
  0x10   : > { %s316_s20 = sshll.u32 %s3737_s19, 4  ;;  %s3738_s22 = smov [#allocation8]   ;;  %s3845_s20 = int_to_ptr.vmem [resolvable:$true] %s316_s20 }
  0x11   : > { %s4289_s16 = scalar_select %p3830_p3, 1, 0 }
  0x12   : > { %p3319_p5 = pneg %p3830_p3  ;;  %s3847_s23 = sshll.u32 %s3738_s22, 4  ;;  %s282_s23 = int_to_ptr.vmem [resolvable:$true] %s3847_s23 }
  0x13   : > { %s4291_s2 = sld [smem:[#allocation24_spill]] }
  0x14   : > { %p3841_p6 = pnand %p3319_p5, %p4285_p1 }
  0x16   : > { %p3857_p8 = pneg %p3841_p6 }
  0x19   : > { %s3425_s26 = scalar_lea.hbm %s4291_s2, 32 }
  0x1a   : > { %p3426_p7 = scmp.ne.s32.totalorder %s4291_s2, %s3425_s26  ;;  %p3432_p11 = scmp.lt.u32.totalorder %s3425_s26, %s4291_s2 }
  0x1c   : > { %p3428_p9 = pnand %p3857_p8, %p3426_p7 }
  0x1e   : > { %p3429_p10 = pneg %p3428_p9 }
  0x20   : > { %p3434_p12 = pnand %p3432_p11, %p3429_p10 }
  0x22   : > { %3437 = shalt.err (!%p3434_p12)
}
  0x23   : > { %s3438_s19 = scalar_lea.vmem %s3828_s14, 32  ;;  %p3446_p5 = scmp.lt.s32.totalorder %s3828_s14, %s3828_s14 }
  0x24   : > { %p3439_p13 = scmp.ne.s32.totalorder %s3828_s14, %s3438_s19  ;;  %p3447_p4 = scmp.lt.s32.totalorder %s3438_s19, %s3438_s19 }
  0x26   : > { %p3441_p0 = pnand %p3439_p13, %p3857_p8  ;;  %p3448_p7 = por %p3447_p4, %p3446_p5 }
  0x28   : > { %p3442_p2 = pneg %p3441_p0 }
  0x2a   : > { %p3449_p9 = pnand %p3448_p7, %p3442_p2 }
  0x2c   : > { %3452 = shalt.err (!%p3449_p9)
}
  0x2d   : > { %3322 = dma.hbm_to_vmem [thread:$0]  (!%p3841_p6), %s4291_s2, 32, %s3828_s14, [#allocation7]  }
  0x2e   : > { %s3453_s27 = scalar_lea.hbm %s4279_s4, 16 }
  0x2f   : > { %p3454_p10 = scmp.ne.s32.totalorder %s4279_s4, %s3453_s27  ;;  %p3460_p12 = scmp.lt.u32.totalorder %s3453_s27, %s4279_s4 }
  0x31   : > { %p3456_p4 = pnand %p3454_p10, %p3857_p8 }
  0x33   : > { %p3457_p11 = pneg %p3456_p4 }
  0x35   : > { %p3462_p13 = pnand %p3460_p12, %p3457_p11 }
  0x37   : > { %3465 = shalt.err (!%p3462_p13)
}
  0x38   : > { %s3466_s14 = scalar_lea.vmem %s3837_s18, 16  ;;  %s3473_s22 = scalar_lea.vmem %s3837_s18, 32 }
  0x39   : > { %p3467_p0 = scmp.ne.s32.totalorder %s3837_s18, %s3466_s14  ;;  %p3474_p7 = scmp.lt.s32.totalorder %s3837_s18, %s3837_s18 }
  0x3a   : > { %p3475_p9 = scmp.lt.s32.totalorder %s3473_s22, %s3466_s14 }
  0x3b   : > { %p3469_p2 = pnand %p3467_p0, %p3857_p8 }
  0x3c   : > { %p3476_p10 = por %p3475_p9, %p3474_p7 }
  0x3d   : > { %p3470_p5 = pneg %p3469_p2 }
  0x3f   : > { %p3477_p4 = pnand %p3476_p10, %p3470_p5 }
  0x41   : > { %3480 = shalt.err (!%p3477_p4)
}
  0x42   : > { %3328 = dma.hbm_to_vmem [thread:$0]  (!%p3841_p6), %s4279_s4, 16, %s3837_s18, [#allocation10]  }
  0x43   : > { %s3481_s28 = scalar_lea.hbm %s4281_s6, 96 }
  0x44   : > { %p3482_p11 = scmp.ne.s32.totalorder %s4281_s6, %s3481_s28  ;;  %p3488_p0 = scmp.lt.u32.totalorder %s3481_s28, %s4281_s6 }
  0x46   : > { %p3484_p12 = pnand %p3482_p11, %p3857_p8 }
  0x48   : > { %p3485_p13 = pneg %p3484_p12 }
  0x4a   : > { %p3490_p2 = pnand %p3488_p0, %p3485_p13 }
  0x4c   : > { %3493 = shalt.err (!%p3490_p2)
}
  0x4d   : > { %s3494_s18 = scalar_lea.vmem %s3845_s20, 96  ;;  %p3502_p10 = scmp.lt.s32.totalorder %s3845_s20, %s3845_s20 }
  0x4e   : > { %p3495_p5 = scmp.ne.s32.totalorder %s3845_s20, %s3494_s18  ;;  %p3503_p4 = scmp.lt.s32.totalorder %s3494_s18, %s3494_s18 }
  0x50   : > { %p3497_p7 = pnand %p3495_p5, %p3857_p8  ;;  %p3504_p11 = por %p3503_p4, %p3502_p10 }
  0x52   : > { %p3498_p9 = pneg %p3497_p7 }
  0x54   : > { %p3505_p12 = pnand %p3504_p11, %p3498_p9 }
  0x56   : > { %3508 = shalt.err (!%p3505_p12)
}
  0x57   : > { %3334 = dma.hbm_to_vmem [thread:$0]  (!%p3841_p6), %s4281_s6, 96, %s3845_s20, [#allocation13]  }
  0x58   : > { %s3739_s25 = smov [#allocation11]   ;;  %s3509_s13 = scalar_lea.hbm %s4278_s3, 32 }
  0x59   : > { %s302_s26 = sshll.u32 %s3739_s25, 4  ;;  %p3510_p13 = scmp.ne.s32.totalorder %s4278_s3, %s3509_s13  ;;  %s303_s26 = int_to_ptr.vmem [resolvable:$true] %s302_s26 }
  0x5a   : > { %p3516_p5 = scmp.lt.u32.totalorder %s3509_s13, %s4278_s3 }
  0x5b   : > { %p3512_p0 = pnand %p3510_p13, %p3857_p8 }
  0x5d   : > { %p3513_p2 = pneg %p3512_p0 }
  0x5f   : > { %p3518_p7 = pnand %p3516_p5, %p3513_p2 }
  0x61   : > { %3521 = shalt.err (!%p3518_p7)
}
  0x62   : > { %s3522_s20 = scalar_lea.vmem %s282_s23, 32  ;;  %p3530_p11 = scmp.lt.s32.totalorder %s282_s23, %s282_s23 }
  0x63   : > { %p3523_p9 = scmp.ne.s32.totalorder %s282_s23, %s3522_s20  ;;  %p3531_p12 = scmp.lt.s32.totalorder %s3522_s20, %s3522_s20 }
  0x65   : > { %p3525_p10 = pnand %p3523_p9, %p3857_p8  ;;  %p3532_p1 = por %p3531_p12, %p3530_p11 }
  0x67   : > { %p3526_p4 = pneg %p3525_p10 }
  0x69   : > { %p3533_p3 = pnand %p3532_p1, %p3526_p4 }
  0x6b   : > { %3536 = shalt.err (!%p3533_p3)
}
  0x6c   : > { %3325 = dma.hbm_to_vmem [thread:$0]  (!%p3841_p6), %s4278_s3, 32, %s282_s23, [#allocation7]  }
  0x6d   : > { %s3537_s28 = scalar_lea.hbm %s4280_s5, 49152 }
  0x6e   : > { %p3538_p13 = scmp.ne.s32.totalorder %s4280_s5, %s3537_s28  ;;  %p3544_p3 = scmp.lt.u32.totalorder %s3537_s28, %s4280_s5 }
  0x70   : > { %p3540_p0 = pnand %p3538_p13, %p3857_p8 }
  0x72   : > { %p3541_p1 = pneg %p3540_p0 }
  0x74   : > { %p3546_p2 = pnand %p3544_p3, %p3541_p1 }
  0x76   : > { %3549 = shalt.err (!%p3546_p2)
}
  0x77   : > { %s3550_s18 = scalar_lea.vmem %s303_s26, 49152  ;;  %p3558_p10 = scmp.lt.s32.totalorder %s303_s26, %s303_s26 }
  0x78   : > { %p3551_p5 = scmp.ne.s32.totalorder %s303_s26, %s3550_s18  ;;  %p3559_p4 = scmp.lt.s32.totalorder %s3550_s18, %s3550_s18 }
  0x7a   : > { %p3553_p7 = pnand %p3551_p5, %p3857_p8  ;;  %p3560_p11 = por %p3559_p4, %p3558_p10 }
  0x7c   : > { %p3554_p9 = pneg %p3553_p7 }
  0x7e   : > { %p3561_p12 = pnand %p3560_p11, %p3554_p9 }
  0x80   : > { %3564 = shalt.err (!%p3561_p12)
}
  0x81   : > { %s3740_s23 = smov 768   ;;  %s3741_s20 = smov 48  }
  0x82   : > { %3331 = dma.hbm_to_vmem [thread:$0]  (!%p3841_p6), %s4280_s5, 49152, %s303_s26, [#allocation10], %s3740_s23, %s3740_s23, %s3741_s20  }
  0x83   : > { %s3742_s25 = smov [#allocation14]   ;;  %s3565_s17 = scalar_lea.hbm %s4282_s7, 12288 }
  0x84   : > { %s326_s27 = sshll.u32 %s3742_s25, 4  ;;  %p3566_p13 = scmp.ne.s32.totalorder %s4282_s7, %s3565_s17  ;;  %s327_s27 = int_to_ptr.vmem [resolvable:$true] %s326_s27 }
  0x85   : > { %p3572_p3 = scmp.lt.u32.totalorder %s3565_s17, %s4282_s7 }
  0x86   : > { %p3568_p0 = pnand %p3566_p13, %p3857_p8 }
  0x88   : > { %p3569_p1 = pneg %p3568_p0 }
  0x8a   : > { %p3574_p2 = pnand %p3572_p3, %p3569_p1 }
  0x8c   : > { %3577 = shalt.err (!%p3574_p2)
}
  0x8d   : > { %s3578_s26 = scalar_lea.vmem %s327_s27, 12288  ;;  %p3586_p10 = scmp.lt.s32.totalorder %s327_s27, %s327_s27 }
  0x8e   : > { %p3579_p5 = scmp.ne.s32.totalorder %s327_s27, %s3578_s26  ;;  %p3587_p4 = scmp.lt.s32.totalorder %s3578_s26, %s3578_s26 }
  0x90   : > { %p3581_p7 = pnand %p3579_p5, %p3857_p8  ;;  %p3588_p11 = por %p3587_p4, %p3586_p10 }
  0x92   : > { %p3582_p9 = pneg %p3581_p7 }
  0x94   : > { %p3589_p12 = pnand %p3588_p11, %p3582_p9 }
  0x96   : > { %3592 = shalt.err (!%p3589_p12)
}
  0x97   : > { %s3743_s23 = smov 128   ;;  %s3744_s20 = smov 8  }
  0x98   : > { %3337 = dma.hbm_to_vmem [thread:$0]  (!%p3841_p6), %s4282_s7, 12288, %s327_s27, [#allocation13], %s3743_s23, %s3743_s23, %s3744_s20  }
  0x99   : > { %s3745_s24 = smov [#allocation15]   ;;  %s3593_s17 = scalar_lea.hbm %s4283_s8, 16 }
  0x9a   : > { %s340_s25 = sshll.u32 %s3745_s24, 4  ;;  %p3594_p13 = scmp.ne.s32.totalorder %s4283_s8, %s3593_s17  ;;  %s341_s25 = int_to_ptr.vmem [resolvable:$true] %s340_s25 }
  0x9b   : > { %p3600_p3 = scmp.lt.u32.totalorder %s3593_s17, %s4283_s8 }
  0x9c   : > { %p3596_p0 = pnand %p3594_p13, %p3857_p8 }
  0x9e   : > { %p3597_p1 = pneg %p3596_p0 }
  0xa0   : > { %p3602_p2 = pnand %p3600_p3, %p3597_p1 }
  0xa2   : > { %3605 = shalt.err (!%p3602_p2)
}
  0xa3   : > { %s3606_s27 = scalar_lea.vmem %s341_s25, 16  ;;  %s3613_s23 = scalar_lea.vmem %s341_s25, 32 }
  0xa4   : > { %p3607_p5 = scmp.ne.s32.totalorder %s341_s25, %s3606_s27  ;;  %p3614_p10 = scmp.lt.s32.totalorder %s341_s25, %s341_s25 }
  0xa5   : > { %p3615_p4 = scmp.lt.s32.totalorder %s3613_s23, %s3606_s27 }
  0xa6   : > { %p3609_p7 = pnand %p3607_p5, %p3857_p8 }
  0xa7   : > { %p3616_p11 = por %p3615_p4, %p3614_p10 }
  0xa8   : > { %p3610_p9 = pneg %p3609_p7 }
  0xaa   : > { %p3617_p12 = pnand %p3616_p11, %p3610_p9 }
  0xac   : > { %3620 = shalt.err (!%p3617_p12)
}
  0xad   : > { %3340 = dma.hbm_to_vmem [thread:$0]  (!%p3841_p6), %s4283_s8, 16, %s341_s25, [#allocation16]  }
  0xae   : > { %s2531_s29 = sadd.s32 4294967294, %s3733_s12   ;;  %s4000_s21 = sadd.s32 1, %s3733_s12  }
  0xaf   : > { %s36_s22 = sadd.s32 1, %s3729_s11  ;;  %s33_s24 = ssub.s32 %s3733_s12, %s4000_s21 }
  0xb0   : > { %p43_p8 = scmp.ne.s32.totalorder %s3729_s11, %s3725_s10  ;;  %p34_p13 = scmp.eq.s32.totalorder %s33_s24, 0 }
  0xb1   : > { %p44_p0 = scmp.eq.s32.totalorder %s3733_s12, 0  ;;  %p49_p1 = scmp.ne.s32.totalorder %s3725_s10, %s3721_s30 }
  0xb2   : > { %p241_p3 = scmp.eq.s32.totalorder %s3823_s15, 1  ;;  %p4293_p5 = scmp.eq.s32.totalorder %s3823_s15, 0 }
  0xb3   : > { %s4012_s28 = scalar_select %p34_p13, %s3729_s11, %s36_s22  }
  0xb4   : > { %p45_p2 = por %p44_p0, %p43_p8  ;;  %p4016_p7 = por %p4293_p5, %p49_p1 }
  0xb5   : > { %p4020_p6 = por %p241_p3, %p43_p8  ;;  %p247_p9 = scmp.eq.s32.totalorder %s2531_s29, 1 }
  0xb6   : > { %p3356_p10 = scmp.lt.s32.totalorder %s3733_s12, 2  ;;  %s351_s17 = sand.u32 1, %s3729_s11  }
  0xb7   : > { %s4295_s25 = scalar_select %p4020_p6, 1, 0 }
  0xb8   : > { %p4026_p4 = por %p247_p9, %p49_p1  ;;  %s2541_s14 = sshll.u32 %s351_s17, 4 }
  0xb9   : > { %s2574_s18 = sshll.u32 %s3733_s12, 8  ;;  %s355_s20 = scalar_lea.vmem [#allocation3], %s2541_s14 }
  0xba   : > { %s4296_s19 = scalar_select %p4026_p4, 1, 0 }
  0xbb   : > { %s4034_s23 = scalar_lea.hbm %s4275_s0, %s2574_s18  ;;  %s362_s2 = sshll.u32 %s355_s20, 4  ;;  %s4040_s2 = int_to_ptr.vmem [resolvable:$true] %s362_s2 }
  0xbc   : > { %p4036_p11 = pnand %p3356_p10, %p45_p2  ;;  %s4042_s22 = scalar_lea.sflag [#allocation4], %s351_s17 }
  0xbd   : > { %s3621_s24 = scalar_lea.hbm %s4034_s23, 256  ;;  %s3626_s26 = scalar_lea.hbm %s4275_s0, 512 }
  0xbe   : > { %p3622_p12 = scmp.ne.s32.totalorder %s4034_s23, %s3621_s24  ;;  %p3623_p8 = pneg %p4036_p11 }
  0xbf   : > { %p3627_p1 = scmp.lt.u32.totalorder %s4034_s23, %s4275_s0  ;;  %p3628_p3 = scmp.lt.u32.totalorder %s3626_s26, %s3621_s24 }
  0xc0   : > { %p3624_p13 = pnand %p3623_p8, %p3622_p12  ;;  %p3630_p5 = scmp.lt.u32.totalorder %s3621_s24, %s4034_s23 }
  0xc1   : > { %p3629_p2 = por %p3628_p3, %p3627_p1 }
  0xc2   : > { %p3625_p0 = pneg %p3624_p13 }
  0xc3   : > { %p3631_p9 = por %p3630_p5, %p3629_p2 }
  0xc5   : > { %p3632_p10 = pnand %p3631_p9, %p3625_p0 }
  0xc7   : > { %3635 = shalt.err (!%p3632_p10)
}
  0xc8   : > { %s3636_s17 = scalar_lea.vmem %s4040_s2, 256  ;;  %s3746_s14 = smov [#allocation3]  }
  0xc9   : > { %p3637_p12 = scmp.ne.s32.totalorder %s4040_s2, %s3636_s17  ;;  %s3641_s18 = sshll.u32 %s3746_s14, 4  ;;  %s3642_s18 = int_to_ptr.vmem [resolvable:$false] %s3641_s18 }
  0xca   : > { %s3643_s27 = scalar_lea.vmem %s3642_s18, 512  ;;  %p3644_p6 = scmp.lt.s32.totalorder %s4040_s2, %s3642_s18 }
  0xcb   : > { %p3639_p13 = pnand %p3637_p12, %p3623_p8  ;;  %p3645_p1 = scmp.lt.s32.totalorder %s3643_s27, %s3636_s17 }
  0xcd   : > { %p3640_p4 = pneg %p3639_p13  ;;  %p3646_p3 = por %p3645_p1, %p3644_p6 }
  0xcf   : > { %p3647_p2 = pnand %p3646_p3, %p3640_p4 }
  0xd1   : > { %3650 = shalt.err (!%p3647_p2)
}
  0xd2   : > { %s3747_s24 = smov 32   ;;  %s3748_s26 = smov 2  }
  0xd3   : > { %3344 = dma.hbm_to_vmem [thread:$0]  (!%p4036_p11), %s4034_s23, 256, %s4040_s2, %s4042_s22, %s3747_s24, %s3747_s24, %s3748_s26  }
  0xd4   : > { %p4298_p8 = scmp.ne.s32.totalorder %s4289_s16, 0 }
  0xd5   : > { %s4073_s20 = sand.u32 (!%p4298_p8), 1, %s3725_s10  }
  0xd6   : > { %374 = sbr.rel (%p4298_p8) target bundleno = 1504 (0x5e0), region = 56  ;;  %s2545_s17 = sshll.u32 (!%p4298_p8), %s4073_s20, 4 }
  0xd7   : > { %s377_s14 = scalar_lea.sflag (!%p4298_p8), [#allocation4], %s4073_s20  ;;  %s4077_s18 = scalar_lea.vmem (!%p4298_p8), [#allocation3], %s2545_s17 }
  0xdd   : > { %3696 = dma.done.wait (%p4016_p7), %s377_s14, 256  }
  0xde   : > { %3698 = vsyncadd (%p4016_p7), %s377_s14, 4294967040  ;;  %p4299_p6 = scmp.eq.s32.totalorder %s3823_s15, 0 }
  0xe0   : > { %3700 = dma.done.wait (%p4299_p6), [#allocation7], 64   ;;  %p4300_p4 = pmov %p4299_p6 }
  0xe2   : > { %3702 = vsyncadd (%p4300_p4), [#allocation7], 4294967232  ;;  %p4301_p11 = pmov %p4300_p4 }
  0xe3   : > { %p4302_p0 = pmov %p4300_p4 }
  0xe4   : > { %3704 = dma.done.wait (%p4301_p11), [#allocation10], 49168  }
  0xe5   : > { %3706 = vsyncadd (%p4302_p0), [#allocation10], 4294918128  ;;  %p4303_p5 = pmov %p4302_p0 }
  0xe6   : > { %p4304_p9 = pmov %p4302_p0 }
  0xe7   : > { %3708 = dma.done.wait (%p4303_p5), [#allocation13], 12384  }
  0xe8   : > { %3710 = vsyncadd (%p4304_p9), [#allocation13], 4294954912  ;;  %p4305_p7 = pmov %p4302_p0 }
  0xe9   : > { %p4306_p10 = pmov %p4302_p0 }
  0xea   : > { %3712 = dma.done.wait (%p4305_p7), [#allocation16], 16  }
  0xeb   : > { %3714 = vsyncadd (%p4306_p10), [#allocation16], 4294967280  ;;  %v3749_v0 = vmov 1983009808   ;;  %v489_v2 = vlaneseq  ;;  %v460_v3 = vld [vmem:[%s4276_s1] sm:$0xff]  ;;  %v461_v4 = vld [vmem:[%s4276_s1 + $0x8] sm:$0xff] }
  0xec   : > { %v487_v1 = vunpack.c.l.s4 %v3749_v0  ;;  %v462_v5 = vld [vmem:[%s4276_s1 + $0x10] sm:$0xff]  ;;  %v2759_v6 = vpack.c.bf16 %v461_v4, %v460_v3  ;;  %v463_v7 = vld [vmem:[%s4276_s1 + $0x18] sm:$0xff]  ;;  %v464_v9 = vld [vmem:[%s4276_s1 + $0x20] sm:$0xff]  ;;  %vm942_vm0 = vcmask 1041408   ;;  %vm895_vm1 = vcmask 15360   ;;  %s2553_s17 = sshll.u32 %s4073_s20, 3 }
  0xed   : > { %v2763_v8 = vpack.c.bf16 %v463_v7, %v462_v5  ;;  %v465_v10 = vld [vmem:[%s4276_s1 + $0x28] sm:$0xff]  ;;  %v4117_v12 = vshrl.u32 %v489_v2, 7  ;;  %v466_v13 = vld [vmem:[%s4276_s1 + $0x30] sm:$0xff]  ;;  %v467_v15 = vld [vmem:[%s4276_s1 + $0x38] sm:$0xff]  ;;  %s2571_s14 = sshll.u32 %s3823_s15, 7  ;;  %s442_s16 = scalar_lea.vmem [#allocation17], %s2553_s17 }
  0xee   : > { %v488_v11 = vunpack.c.0.s8 %v487_v1  ;;  %2760 = vmatprep.subr.bf16.mxu0 %v2759_v6  ;;  %v2767_v14 = vpack.c.bf16 %v465_v10, %v464_v9  ;;  %v444_v16 = vld [vmem:[%s4077_s18] sm:$0x3]  ;;  %v445_v17 = vld [vmem:[%s4077_s18 + $0x2] sm:$0x3]  ;;  %v446_v18 = vld [vmem:[%s4077_s18 + $0x4] sm:$0x3]  ;;  %v2771_v26 = vpack.c.bf16 %v467_v15, %v466_v13  ;;  %s4231_s29 = scalar_lea.hbm %s4284_s9, %s2571_s14 }
  0xef   : > { %2762 = vmatpush3.bf16.msra.mxu0 %v2759_v6  ;;  %v447_v19 = vld [vmem:[%s4077_s18 + $0x6] sm:$0x3]  ;;  %v452_v20 = vmax.f32 %v444_v16, 0.0  ;;  %v453_v21 = vmax.f32 %v445_v17, 0.0  ;;  %v454_v23 = vmax.f32 %v446_v18, 0.0  ;;  %v469_v29 = vld [vmem:[%s4276_s1 + $0x48] sm:$0xff] }
  0xf0   : > { %2764 = vmatprep.subr.bf16.mxu0 %v2763_v8  ;;  %v4130_v22 = vsub.s32 %v488_v11, %v4117_v12  ;;  %v455_v24 = vmax.f32 %v447_v19, 0.0  ;;  %v468_v28 = vld [vmem:[%s4276_s1 + $0x40] sm:$0xff]  ;;  %v470_v34 = vld [vmem:[%s4276_s1 + $0x50] sm:$0xff]  ;;  %v471_v35 = vld [vmem:[%s4276_s1 + $0x58] sm:$0xff]  ;;  %s2394_s13 = sshll.u32 %s442_s16, 4  ;;  %s2381_s22 = scalar_lea.sflag [#allocation5], %s4073_s20  ;;  %s4233_s13 = int_to_ptr.vmem [resolvable:$true] %s2394_s13 }
  0xf1   : > { %v484_v25 = vcombine.low %v452_v20, %v453_v21  ;;  %v2775_v32 = vpack.c.bf16 %v469_v29, %v468_v28  ;;  %v448_v36 = vld [vmem:[%s4077_s18 + $0x8] sm:$0x3]  ;;  %v449_v37 = vld [vmem:[%s4077_s18 + $0xa] sm:$0x3]  ;;  %v450_v38 = vld [vmem:[%s4077_s18 + $0xc] sm:$0x3]  ;;  %v2779_v40 = vpack.c.bf16 %v471_v35, %v470_v34 }
  0xf2   : > { %v485_v27 = vcombine.low %v454_v23, %v455_v24  ;;  %v451_v39 = vld [vmem:[%s4077_s18 + $0xe] sm:$0x3]  ;;  %v472_v41 = vld [vmem:[%s4276_s1 + $0x60] sm:$0xff]  ;;  %v456_v43 = vmax.f32 %v448_v36, 0.0  ;;  %v457_v44 = vmax.f32 %v449_v37, 0.0  ;;  %v458_v45 = vmax.f32 %v450_v38, 0.0 }
  0xf3   : > { %2766 = vmatpush3.bf16.msra.mxu0 %v2763_v8  ;;  %v492_v30 = vrot.slane %v484_v25, %v4130_v22  ;;  %v473_v42 = vld [vmem:[%s4276_s1 + $0x68] sm:$0xff]  ;;  %v459_v46 = vmax.f32 %v451_v39, 0.0  ;;  %v474_v48 = vld [vmem:[%s4276_s1 + $0x70] sm:$0xff]  ;;  %v475_v49 = vld [vmem:[%s4276_s1 + $0x78] sm:$0xff]  ;;  %s3651_s27 = scalar_lea.vmem %s4233_s13, 128  ;;  %p4307_p13 = scmp.ne.s32.totalorder %s4295_s25, 0 }
  0xf4   : > { %2768 = vmatprep.subr.bf16.mxu0 %v2767_v14  ;;  %v499_v31 = vrot.slane %v485_v27, %v4130_v22  ;;  %v2783_v47 = vpack.c.bf16 %v473_v42, %v472_v41  ;;  %v501_v50 = vcombine.low %v456_v43, %v457_v44  ;;  %v2787_v52 = vpack.c.bf16 %v475_v49, %v474_v48  ;;  %v929_v4 = vld [vmem:[#allocation8] sm:$0x3]  ;;  %v928_v5 = vld [vmem:[#allocation6] sm:$0x3]  ;;  %v1175_v6 = vld [vmem:[#allocation11 + $0x8] sm:$0xff]  ;;  %p3652_p12 = scmp.ne.s32.totalorder %s4233_s13, %s3651_s27  ;;  %s3751_s15 = smov [#allocation17]  }
  0xf5   : > { %v502_v51 = vcombine.low %v458_v45, %v459_v46  ;;  %2751 = vmatprep.subr.msk.mxu1 %vm942_vm0, %v928_v5  ;;  %v1181_v7 = vld [vmem:[#allocation11 + $0x38] sm:$0xff]  ;;  %v1183_v10 = vld [vmem:[#allocation11 + $0x48] sm:$0xff]  ;;  %v1174_v24 = vld [vmem:[#allocation11] sm:$0xff]  ;;  %s3655_s24 = sshll.u32 %s3751_s15, 4  ;;  %s3656_s24 = int_to_ptr.vmem [resolvable:$false] %s3655_s24 }
  0xf6   : > { %v500_v33 = vcombine.low %v492_v30, %v499_v31  ;;  %v509_v53 = vrot.slane %v501_v50, %v4130_v22  ;;  %2752 = vmatpush3.msk.msra.mxu1 %vm942_vm0, %v928_v5  ;;  %v1177_v8 = vld [vmem:[#allocation11 + $0x18] sm:$0xff]  ;;  %v2791_v9 = vpack.c.bf16 %v1181_v7, %v1175_v6  ;;  %v1180_v25 = vld [vmem:[#allocation11 + $0x30] sm:$0xff]  ;;  %v1182_v27 = vld [vmem:[#allocation11 + $0x40] sm:$0xff]  ;;  %p3653_p1 = pnand %p3652_p12, %p4307_p13  ;;  %s3657_s18 = scalar_lea.vmem %s3656_s24, 256 }
  0xf7   : > { %2770 = vmatpush3.bf16.msra.mxu0 %v2767_v14  ;;  %v516_v54 = vrot.slane %v502_v51, %v4130_v22  ;;  %v2919_v11 = vpack.c.bf16 %v1183_v10, %v1177_v8  ;;  %v1187_v28 = vld [vmem:[#allocation11 + $0x68] sm:$0xff]  ;;  %v1193_v29 = vld [vmem:[#allocation11 + $0x98] sm:$0xff]  ;;  %v1188_v34 = vld [vmem:[#allocation11 + $0x70] sm:$0xff]  ;;  %v2793_v38 = vpack.c.bf16 %v1180_v25, %v1174_v24  ;;  %p3658_p2 = scmp.lt.s32.totalorder %s4233_s13, %s3656_s24  ;;  %p3659_p8 = scmp.lt.s32.totalorder %s3657_s18, %s3651_s27 }
  0xf8   : > { %2772 = vmatprep.subr.bf16.mxu0 %v2771_v26  ;;  %2740 = vmatprep.mubr.f32.mxu0 %v500_v33  ;;  %v1189_v30 = vld [vmem:[#allocation11 + $0x78] sm:$0xff]  ;;  %v1195_v31 = vld [vmem:[#allocation11 + $0xa8] sm:$0xff]  ;;  %v1192_v33 = vld [vmem:[#allocation11 + $0x90] sm:$0xff]  ;;  %v2795_v42 = vpack.c.bf16 %v1193_v29, %v1187_v28  ;;  %p3654_p3 = pneg %p3653_p1 }
  0xf9   : > { %v517_v55 = vcombine.low %v509_v53, %v516_v54  ;;  %2792 = vmatprep.subr.bf16.mxu1 %v2791_v9  ;;  %v1194_v35 = vld [vmem:[#allocation11 + $0xa0] sm:$0xff]  ;;  %v2923_v43 = vpack.c.bf16 %v1195_v31, %v1189_v30  ;;  %v1199_v44 = vld [vmem:[#allocation11 + $0xc8] sm:$0xff]  ;;  %v1205_v45 = vld [vmem:[#allocation11 + $0xf8] sm:$0xff]  ;;  %p3660_p6 = por %p3659_p8, %p3658_p2 }
  0xfa   : > { %v1201_v46 = vld [vmem:[#allocation11 + $0xd8] sm:$0xff]  ;;  %v1198_v48 = vld [vmem:[#allocation11 + $0xc0] sm:$0xff]  ;;  %v1204_v49 = vld [vmem:[#allocation11 + $0xf0] sm:$0xff]  ;;  %v2925_v53 = vpack.c.bf16 %v1194_v35, %v1188_v34  ;;  %v2799_v54 = vpack.c.bf16 %v1205_v45, %v1199_v44 }
  0xfb   : > { %2774 = vmatpush3.bf16.msra.mxu0 %v2771_v26  ;;  %v1176_v26 = vld [vmem:[#allocation11 + $0x10] sm:$0xff]  ;;  %v1218_v5 = vld [vmem:[#allocation11 + $0x160] sm:$0xff]  ;;  %v1223_v6 = vld [vmem:[#allocation11 + $0x188] sm:$0xff]  ;;  %p3661_p4 = pnand %p3660_p6, %p3654_p3 }
  0xfc   : > { %2776 = vmatprep.subr.bf16.mxu0 %v2775_v32  ;;  %v2921_v39 = vpack.c.bf16 %v1182_v27, %v1176_v26  ;;  %v1229_v7 = vld [vmem:[#allocation11 + $0x1b8] sm:$0xff]  ;;  %v1231_v9 = vld [vmem:[#allocation11 + $0x1c8] sm:$0xff]  ;;  %v1234_v26 = vld [vmem:[#allocation11 + $0x1e0] sm:$0xff] }
  0xfd   : > { %v1225_v8 = vld [vmem:[#allocation11 + $0x198] sm:$0xff]  ;;  %v1240_v27 = vld [vmem:[#allocation11 + $0x210] sm:$0xff]  ;;  %v1242_v31 = vld [vmem:[#allocation11 + $0x220] sm:$0xff] }
  0xfe   : > { %v1236_v30 = vld [vmem:[#allocation11 + $0x1f0] sm:$0xff]  ;;  %v1249_v34 = vld [vmem:[#allocation11 + $0x258] sm:$0xff]  ;;  %v1255_v35 = vld [vmem:[#allocation11 + $0x288] sm:$0xff] }
  0xff   : > { %2778 = vmatpush3.bf16.msra.mxu0 %v2775_v32  ;;  %v1186_v32 = vld [vmem:[#allocation11 + $0x60] sm:$0xff]  ;;  %v1259_v44 = vld [vmem:[#allocation11 + $0x2a8] sm:$0xff]  ;;  %v1265_v45 = vld [vmem:[#allocation11 + $0x2d8] sm:$0xff] }
 0x100   : > { %2780 = vmatprep.subr.bf16.mxu0 %v2779_v40 }
 0x103   : > { %2782 = vmatpush3.bf16.msra.mxu0 %v2779_v40 }
 0x104   : > { %2784 = vmatprep.subr.bf16.mxu0 %v2783_v47 }
 0x107   : > { %2786 = vmatpush3.bf16.msra.mxu0 %v2783_v47  ;;  %v1207_v47 = vld [vmem:[#allocation11 + $0x108] sm:$0xff] }
 0x108   : > { %2788 = vmatprep.subr.bf16.mxu0 %v2787_v52 }
 0x10b   : > { %2790 = vmatpush3.bf16.msra.mxu0 %v2787_v52  ;;  %v2797_v52 = vpack.c.bf16 %v1192_v33, %v1186_v32  ;;  %v1247_v32 = vld [vmem:[#allocation11 + $0x248] sm:$0xff]  ;;  %v1253_v33 = vld [vmem:[#allocation11 + $0x278] sm:$0xff] }
 0x10c   : > { %2743 = vmatprep.subr.msk.mxu0 %vm942_vm0, %v929_v4 }
 0x10e   : > { %2741 = vmatmul.mubr.f32.vlgmr.msra.gmra.mrb[0].mxu0 %v517_v55  ;;  %v2927_v55 = vpack.c.bf16 %v1207_v47, %v1201_v46  ;;  %v1261_v46 = vld [vmem:[#allocation11 + $0x2b8] sm:$0xff]  ;;  %v1267_v47 = vld [vmem:[#allocation11 + $0x2e8] sm:$0xff] }
 0x10f   : > { %2744 = vmatpush3.msk.msra.mxu0 %vm942_vm0, %v929_v4  ;;  %v1212_v4 = vld [vmem:[#allocation11 + $0x130] sm:$0xff] }
 0x110   : > { %2920 = vmatprep.subr.bf16.mxu0 %v2919_v11  ;;  %v2933_v11 = vpack.c.bf16 %v1218_v5, %v1212_v4  ;;  %v1283_v4 = vld [vmem:[#allocation11 + $0x368] sm:$0xff]  ;;  %v1289_v5 = vld [vmem:[#allocation11 + $0x398] sm:$0xff] }
 0x1e1   : > { %v2742_v56 = vpop.f32.mrb[0].mxu0 }
 0x1e2   : > { %v621_v57 = vrot.slane %v2742_v56, %v4130_v22  ;;  %v586_v58 = vpop.f32.mrb[1].mxu0  ;;  %v614_v63 = vcombine.high %v2742_v56, %v2742_v56  ;;  %v1200_v56 = vld [vmem:[#allocation11 + $0xd0] sm:$0xff] }
 0x1e3   : > { %v604_v59 = vrot.slane %v586_v58, %v4130_v22  ;;  %v597_v60 = vcombine.high %v586_v58, %v586_v58  ;;  %v1211_v58 = vld [vmem:[#allocation11 + $0x128] sm:$0xff] }
 0x1e4   : > { %v629_v61 = vcombine.high %v621_v57, %v621_v57  ;;  %v628_v2 = vrot.slane %v614_v63, %v4130_v22 }
 0x1e5   : > { %639 = vxpose.xlu0.b32.start.end [1/1] (short) (narrow) %v604_v59, 8  ;;  %v612_v62 = vcombine.high %v604_v59, %v604_v59  ;;  %v611_v0 = vrot.slane %v597_v60, %v4130_v22  ;;  %v1217_v59 = vld [vmem:[#allocation11 + $0x158] sm:$0xff] }
 0x1e6   : > { %799 = vxpose.xlu1.b32.start.end [1/1] (short) (narrow) %v629_v61, 8  ;;  %v630_v3 = vcombine.high %v628_v2, %v628_v2  ;;  %v1213_v60 = vld [vmem:[#allocation11 + $0x138] sm:$0xff]  ;;  %v1219_v61 = vld [vmem:[#allocation11 + $0x168] sm:$0xff] }
 0x1e7   : > { %v613_v1 = vcombine.high %v611_v0, %v611_v0 }
 0x1e9   : > { %671 = vxpose.xlu0.b32.start.end [1/1] (short) (narrow) %v612_v62, 8  ;;  %v2801_v62 = vpack.c.bf16 %v1204_v49, %v1198_v48 }
 0x1ea   : > { %703 = vxpose.xlu1.b32.start.end [1/1] (short) (narrow) %v611_v0, 8  ;;  %v1210_v0 = vld [vmem:[#allocation11 + $0x120] sm:$0xff] }
 0x1ed   : > { %767 = vxpose.xlu0.b32.start.end [1/1] (short) (narrow) %v621_v57, 8  ;;  %v1206_v57 = vld [vmem:[#allocation11 + $0x100] sm:$0xff] }
 0x1ee   : > { %735 = vxpose.xlu1.b32.start.end [1/1] (short) (narrow) %v613_v1, 8  ;;  %v2929_v63 = vpack.c.bf16 %v1206_v57, %v1200_v56  ;;  %v1216_v1 = vld [vmem:[#allocation11 + $0x150] sm:$0xff]  ;;  %v1271_v56 = vld [vmem:[#allocation11 + $0x308] sm:$0xff]  ;;  %v1277_v57 = vld [vmem:[#allocation11 + $0x338] sm:$0xff] }
 0x1ef   : > { %v2805_v10 = vpack.c.bf16 %v1216_v1, %v1210_v0  ;;  %v2823_v0 = vpack.c.bf16 %v1277_v57, %v1271_v56  ;;  %v1331_v56 = vld [vmem:[#allocation11 + $0x4e8] sm:$0xff]  ;;  %v1337_v57 = vld [vmem:[#allocation11 + $0x518] sm:$0xff] }
 0x1f1   : > { %831 = vxpose.xlu0.b32.start.end [1/1] (short) (narrow) %v628_v2, 8  ;;  %v2803_v2 = vpack.c.bf16 %v1217_v59, %v1211_v58  ;;  %v1273_v58 = vld [vmem:[#allocation11 + $0x318] sm:$0xff]  ;;  %v1279_v59 = vld [vmem:[#allocation11 + $0x348] sm:$0xff] }
 0x1f2   : > { %863 = vxpose.xlu1.b32.start.end [1/1] (short) (narrow) %v630_v3, 8  ;;  %v2931_v3 = vpack.c.bf16 %v1219_v61, %v1213_v60  ;;  %v2951_v1 = vpack.c.bf16 %v1279_v59, %v1273_v58  ;;  %v1333_v58 = vld [vmem:[#allocation11 + $0x4f8] sm:$0xff]  ;;  %v2843_v59 = vpack.c.bf16 %v1337_v57, %v1331_v56 }
 0x265   : > { %v655_v13 = vpop.trf.xlu0 }
 0x266   : > { %896 = vst.msk [vmem:[#allocation2] sm:$0xff] %vm895_vm1, %v655_v13  ;;  %v815_v14 = vpop.trf.xlu1  ;;  %v1222_v13 = vld [vmem:[#allocation11 + $0x180] sm:$0xff] }
 0x267   : > { %901 = vst.msk [vmem:[#allocation2 + $0x28] sm:$0xff] %vm895_vm1, %v815_v14  ;;  %v1228_v14 = vld [vmem:[#allocation11 + $0x1b0] sm:$0xff] }
 0x268   : > { %v2809_v24 = vpack.c.bf16 %v1228_v14, %v1222_v13  ;;  %v2827_v13 = vpack.c.bf16 %v1289_v5, %v1283_v4  ;;  %v1343_v4 = vld [vmem:[#allocation11 + $0x548] sm:$0xff]  ;;  %v1349_v5 = vld [vmem:[#allocation11 + $0x578] sm:$0xff] }
 0x269   : > { %v687_v15 = vpop.trf.xlu0 }
 0x26a   : > { %897 = vst.msk [vmem:[#allocation2 + $0x8] sm:$0xff] %vm895_vm1, %v687_v15  ;;  %v719_v16 = vpop.trf.xlu1  ;;  %v2807_v15 = vpack.c.bf16 %v1229_v7, %v1223_v6  ;;  %v1285_v6 = vld [vmem:[#allocation11 + $0x378] sm:$0xff]  ;;  %v1291_v7 = vld [vmem:[#allocation11 + $0x3a8] sm:$0xff] }
 0x26b   : > { %898 = vst.msk [vmem:[#allocation2 + $0x10] sm:$0xff] %vm895_vm1, %v719_v16  ;;  %v2935_v16 = vpack.c.bf16 %v1231_v9, %v1225_v8  ;;  %v2955_v14 = vpack.c.bf16 %v1291_v7, %v1285_v6  ;;  %v1345_v6 = vld [vmem:[#allocation11 + $0x558] sm:$0xff]  ;;  %v2847_v7 = vpack.c.bf16 %v1349_v5, %v1343_v4 }
 0x26d   : > { %v783_v17 = vpop.trf.xlu0 }
 0x26e   : > { %900 = vst.msk [vmem:[#allocation2 + $0x20] sm:$0xff] %vm895_vm1, %v783_v17  ;;  %v751_v18 = vpop.trf.xlu1  ;;  %v1224_v17 = vld [vmem:[#allocation11 + $0x190] sm:$0xff] }
 0x26f   : > { %899 = vst.msk [vmem:[#allocation2 + $0x18] sm:$0xff] %vm895_vm1, %v751_v18  ;;  %v1230_v18 = vld [vmem:[#allocation11 + $0x1c0] sm:$0xff] }
 0x270   : > { %v2937_v25 = vpack.c.bf16 %v1230_v18, %v1224_v17  ;;  %v1295_v17 = vld [vmem:[#allocation11 + $0x3c8] sm:$0xff]  ;;  %v1301_v18 = vld [vmem:[#allocation11 + $0x3f8] sm:$0xff] }
 0x271   : > { %v847_v19 = vpop.trf.xlu0  ;;  %v3413_v20 = vld [vmem:[#allocation2 + $0x4] ss:$8 sps:$4 sm:$0xff]   ;;  %v3415_v21 = vld [vmem:[#allocation2] ss:$8 sps:$4 sm:$0xff]  }
 0x272   : > { %902 = vst.msk [vmem:[#allocation2 + $0x30] sm:$0xff] %vm895_vm1, %v847_v19  ;;  %v879_v23 = vpop.trf.xlu1  ;;  %2745 = vmatprep.mubr.msk.f32.mxu0 %vm895_vm1, %v3413_v20  ;;  %2753 = vmatprep.mubr.msk.f32.mxu1 %vm895_vm1, %v3415_v21  ;;  %v1235_v19 = vld [vmem:[#allocation11 + $0x1e8] sm:$0xff]  ;;  %v1241_v20 = vld [vmem:[#allocation11 + $0x218] sm:$0xff] }
 0x273   : > { %903 = vst.msk [vmem:[#allocation2 + $0x38] sm:$0xff] %vm895_vm1, %v879_v23  ;;  %v1237_v21 = vld [vmem:[#allocation11 + $0x1f8] sm:$0xff]  ;;  %v1243_v23 = vld [vmem:[#allocation11 + $0x228] sm:$0xff]  ;;  %v2811_v28 = vpack.c.bf16 %v1241_v20, %v1235_v19 }
 0x274   : > { %v2939_v29 = vpack.c.bf16 %v1243_v23, %v1237_v21  ;;  %v1297_v19 = vld [vmem:[#allocation11 + $0x3d8] sm:$0xff]  ;;  %v1303_v20 = vld [vmem:[#allocation11 + $0x408] sm:$0xff] }
 0x275   : > { %v3419_v40 = vld [vmem:[#allocation2 + $0x24] ss:$8 sps:$4 sm:$0xff]   ;;  %v3421_v41 = vld [vmem:[#allocation2 + $0x20] ss:$8 sps:$4 sm:$0xff]  }
 0x276   : > { %v3416_v36 = vld [vmem:[#allocation2 + $0x14] ss:$8 sps:$4 sm:$0xff]   ;;  %v3418_v37 = vld [vmem:[#allocation2 + $0x10] ss:$8 sps:$4 sm:$0xff]  }
 0x277   : > { %2746 = vmatmul.mubr.msk.f32.vlgmr.msra.gmra.mrb[2].mxu0 %vm895_vm1, %v3416_v36  ;;  %2754 = vmatmul.mubr.msk.f32.vlgmr.msra.gmra.mrb[0].mxu1 %vm895_vm1, %v3418_v37  ;;  %v2813_v36 = vpack.c.bf16 %v1240_v27, %v1234_v26  ;;  %v2941_v37 = vpack.c.bf16 %v1242_v31, %v1236_v30  ;;  %v2959_v26 = vpack.c.bf16 %v1303_v20, %v1297_v19  ;;  %v1300_v27 = vld [vmem:[#allocation11 + $0x3f0] sm:$0xff]  ;;  %v1357_v19 = vld [vmem:[#allocation11 + $0x5b8] sm:$0xff] }
 0x278   : > { %2748 = vmatprep.mubr.msk.f32.mxu0 %vm895_vm1, %v3419_v40  ;;  %2756 = vmatprep.mubr.msk.f32.mxu1 %vm895_vm1, %v3421_v41  ;;  %v2815_v40 = vpack.c.bf16 %v1253_v33, %v1247_v32  ;;  %v2943_v41 = vpack.c.bf16 %v1255_v35, %v1249_v34  ;;  %v1307_v32 = vld [vmem:[#allocation11 + $0x428] sm:$0xff]  ;;  %v1313_v33 = vld [vmem:[#allocation11 + $0x458] sm:$0xff] }
 0x279   : > { %2794 = vmatpush1.bf16.msra.mxu1 %v2793_v38  ;;  %2922 = vmatpush1.bf16.msra.mxu0 %v2921_v39  ;;  %v1246_v38 = vld [vmem:[#allocation11 + $0x240] sm:$0xff]  ;;  %v1252_v39 = vld [vmem:[#allocation11 + $0x270] sm:$0xff]  ;;  %v1309_v34 = vld [vmem:[#allocation11 + $0x438] sm:$0xff]  ;;  %v2835_v35 = vpack.c.bf16 %v1313_v33, %v1307_v32 }
 0x27a   : > { %v3422_v50 = vld [vmem:[#allocation2 + $0x34] ss:$8 sps:$4 sm:$0xff]   ;;  %v3424_v51 = vld [vmem:[#allocation2 + $0x30] ss:$8 sps:$4 sm:$0xff]   ;;  %2796 = vmatprep.subr.bf16.mxu1 %v2795_v42  ;;  %2924 = vmatprep.subr.bf16.mxu0 %v2923_v43  ;;  %v1254_v43 = vld [vmem:[#allocation11 + $0x280] sm:$0xff]  ;;  %v2817_v48 = vpack.c.bf16 %v1252_v39, %v1246_v38 }
 0x27b   : > { %2749 = vmatmul.mubr.msk.f32.gmra.mrb[4].mxu0 %vm895_vm1, %v3422_v50  ;;  %2757 = vmatmul.mubr.msk.f32.gmra.mrb[2].mxu1 %vm895_vm1, %v3424_v51  ;;  %v1248_v42 = vld [vmem:[#allocation11 + $0x250] sm:$0xff]  ;;  %v1258_v50 = vld [vmem:[#allocation11 + $0x2a0] sm:$0xff]  ;;  %v1369_v32 = vld [vmem:[#allocation11 + $0x618] sm:$0xff] }
 0x27c   : > { %v2945_v49 = vpack.c.bf16 %v1254_v43, %v1248_v42  ;;  %v1264_v51 = vld [vmem:[#allocation11 + $0x2d0] sm:$0xff]  ;;  %v1314_v42 = vld [vmem:[#allocation11 + $0x460] sm:$0xff] }
 0x27d   : > { %2798 = vmatpush1.bf16.msra.mxu1 %v2797_v52  ;;  %2926 = vmatpush1.bf16.msra.mxu0 %v2925_v53  ;;  %v2819_v52 = vpack.c.bf16 %v1265_v45, %v1259_v44  ;;  %v2947_v53 = vpack.c.bf16 %v1267_v47, %v1261_v46  ;;  %v2821_v60 = vpack.c.bf16 %v1264_v51, %v1258_v50  ;;  %v1312_v38 = vld [vmem:[#allocation11 + $0x450] sm:$0xff]  ;;  %v1319_v44 = vld [vmem:[#allocation11 + $0x488] sm:$0xff]  ;;  %v1325_v45 = vld [vmem:[#allocation11 + $0x4b8] sm:$0xff] }
 0x27e   : > { %2800 = vmatprep.subr.bf16.mxu1 %v2799_v54  ;;  %2928 = vmatprep.subr.bf16.mxu0 %v2927_v55  ;;  %v1260_v54 = vld [vmem:[#allocation11 + $0x2b0] sm:$0xff]  ;;  %v1266_v55 = vld [vmem:[#allocation11 + $0x2e0] sm:$0xff]  ;;  %v2839_v46 = vpack.c.bf16 %v1325_v45, %v1319_v44  ;;  %v1321_v47 = vld [vmem:[#allocation11 + $0x498] sm:$0xff] }
 0x27f   : > { %v2949_v61 = vpack.c.bf16 %v1266_v55, %v1260_v54  ;;  %v1324_v51 = vld [vmem:[#allocation11 + $0x4b0] sm:$0xff] }
 0x281   : > { %2802 = vmatpush1.bf16.msra.mxu1 %v2801_v62  ;;  %2930 = vmatpush1.bf16.msra.mxu0 %v2929_v63  ;;  %v1270_v62 = vld [vmem:[#allocation11 + $0x300] sm:$0xff]  ;;  %v1276_v63 = vld [vmem:[#allocation11 + $0x330] sm:$0xff] }
 0x282   : > { %2804 = vmatprep.subr.bf16.mxu1 %v2803_v2  ;;  %2932 = vmatprep.subr.bf16.mxu0 %v2931_v3  ;;  %v1272_v2 = vld [vmem:[#allocation11 + $0x310] sm:$0xff]  ;;  %v1278_v3 = vld [vmem:[#allocation11 + $0x340] sm:$0xff]  ;;  %v2825_v8 = vpack.c.bf16 %v1276_v63, %v1270_v62 }
 0x283   : > { %v2953_v9 = vpack.c.bf16 %v1278_v3, %v1272_v2  ;;  %v1336_v62 = vld [vmem:[#allocation11 + $0x510] sm:$0xff]  ;;  %v1338_v2 = vld [vmem:[#allocation11 + $0x520] sm:$0xff] }
 0x285   : > { %2806 = vmatpush1.bf16.msra.mxu1 %v2805_v10  ;;  %2934 = vmatpush1.bf16.msra.mxu0 %v2933_v11  ;;  %v1282_v10 = vld [vmem:[#allocation11 + $0x360] sm:$0xff]  ;;  %v1288_v11 = vld [vmem:[#allocation11 + $0x390] sm:$0xff] }
 0x286   : > { %2808 = vmatprep.subr.bf16.mxu1 %v2807_v15  ;;  %2936 = vmatprep.subr.bf16.mxu0 %v2935_v16  ;;  %v1284_v15 = vld [vmem:[#allocation11 + $0x370] sm:$0xff]  ;;  %v1290_v16 = vld [vmem:[#allocation11 + $0x3a0] sm:$0xff]  ;;  %v2829_v21 = vpack.c.bf16 %v1288_v11, %v1282_v10 }
 0x287   : > { %v2957_v23 = vpack.c.bf16 %v1290_v16, %v1284_v15  ;;  %v1348_v10 = vld [vmem:[#allocation11 + $0x570] sm:$0xff]  ;;  %v1350_v15 = vld [vmem:[#allocation11 + $0x580] sm:$0xff] }
 0x289   : > { %2810 = vmatpush1.bf16.msra.mxu1 %v2809_v24  ;;  %2938 = vmatpush1.bf16.msra.mxu0 %v2937_v25  ;;  %v1294_v24 = vld [vmem:[#allocation11 + $0x3c0] sm:$0xff]  ;;  %v2831_v25 = vpack.c.bf16 %v1301_v18, %v1295_v17  ;;  %v1355_v17 = vld [vmem:[#allocation11 + $0x5a8] sm:$0xff]  ;;  %v1361_v18 = vld [vmem:[#allocation11 + $0x5d8] sm:$0xff] }
 0x28a   : > { %2812 = vmatprep.subr.bf16.mxu1 %v2811_v28  ;;  %2940 = vmatprep.subr.bf16.mxu0 %v2939_v29  ;;  %v1296_v28 = vld [vmem:[#allocation11 + $0x3d0] sm:$0xff]  ;;  %v1302_v29 = vld [vmem:[#allocation11 + $0x400] sm:$0xff]  ;;  %v2833_v30 = vpack.c.bf16 %v1300_v27, %v1294_v24  ;;  %v2851_v20 = vpack.c.bf16 %v1361_v18, %v1355_v17  ;;  %v1385_v17 = vld [vmem:[#allocation11 + $0x698] sm:$0xff] }
 0x28b   : > { %v2961_v31 = vpack.c.bf16 %v1302_v29, %v1296_v28  ;;  %v1360_v24 = vld [vmem:[#allocation11 + $0x5d0] sm:$0xff]  ;;  %v1362_v28 = vld [vmem:[#allocation11 + $0x5e0] sm:$0xff]  ;;  %v1381_v18 = vld [vmem:[#allocation11 + $0x678] sm:$0xff] }
 0x28c   : > { %v1356_v27 = vld [vmem:[#allocation11 + $0x5b0] sm:$0xff] }
 0x28d   : > { %2814 = vmatpush1.bf16.msra.mxu1 %v2813_v36  ;;  %2942 = vmatpush1.bf16.msra.mxu0 %v2941_v37  ;;  %v1315_v36 = vld [vmem:[#allocation11 + $0x468] sm:$0xff]  ;;  %v1306_v37 = vld [vmem:[#allocation11 + $0x420] sm:$0xff]  ;;  %v2981_v29 = vpack.c.bf16 %v1362_v28, %v1356_v27  ;;  %v1380_v27 = vld [vmem:[#allocation11 + $0x670] sm:$0xff] }
 0x28e   : > { %2816 = vmatprep.subr.bf16.mxu1 %v2815_v40  ;;  %2944 = vmatprep.subr.bf16.mxu0 %v2943_v41  ;;  %v2963_v39 = vpack.c.bf16 %v1315_v36, %v1309_v34  ;;  %v2837_v40 = vpack.c.bf16 %v1312_v38, %v1306_v37  ;;  %v1308_v41 = vld [vmem:[#allocation11 + $0x430] sm:$0xff]  ;;  %v1375_v34 = vld [vmem:[#allocation11 + $0x648] sm:$0xff]  ;;  %v3750_v36 = vmov 1935823168   ;;  %v1386_v28 = vld [vmem:[#allocation11 + $0x6a0] sm:$0xff] }
 0x28f   : > { %v2965_v43 = vpack.c.bf16 %v1314_v42, %v1308_v41  ;;  %v1147_v37 = vunpack.c.l.s4 %v3750_v36  ;;  %v2568_v41 = vld [vmem:[#allocation9] ss:$0 sm:$0xff]  ;;  %v1390_v36 = vld [vmem:[#allocation11 + $0x6c0] sm:$0xff] }
 0x291   : > { %2818 = vmatpush1.bf16.msra.mxu1 %v2817_v48  ;;  %2946 = vmatpush1.bf16.msra.mxu0 %v2945_v49  ;;  %v1327_v48 = vld [vmem:[#allocation11 + $0x4c8] sm:$0xff]  ;;  %v1318_v49 = vld [vmem:[#allocation11 + $0x480] sm:$0xff]  ;;  %v1148_v38 = vunpack.c.0.s8 %v1147_v37  ;;  %v1396_v37 = vld [vmem:[#allocation11 + $0x6f0] sm:$0xff] }
 0x292   : > { %2820 = vmatprep.subr.bf16.mxu1 %v2819_v52  ;;  %2948 = vmatprep.subr.bf16.mxu0 %v2947_v53  ;;  %v2967_v50 = vpack.c.bf16 %v1327_v48, %v1321_v47  ;;  %v1320_v52 = vld [vmem:[#allocation11 + $0x490] sm:$0xff]  ;;  %v1326_v53 = vld [vmem:[#allocation11 + $0x4c0] sm:$0xff]  ;;  %v2841_v54 = vpack.c.bf16 %v1324_v51, %v1318_v49 }
 0x293   : > { %v2969_v55 = vpack.c.bf16 %v1326_v53, %v1320_v52  ;;  %v1151_v47 = vsub.s32 %v1148_v38, %v4117_v12 }
 0x295   : > { %2822 = vmatpush1.bf16.msra.mxu1 %v2821_v60  ;;  %2950 = vmatpush1.bf16.msra.mxu0 %v2949_v61  ;;  %v1339_v60 = vld [vmem:[#allocation11 + $0x528] sm:$0xff]  ;;  %v1330_v61 = vld [vmem:[#allocation11 + $0x4e0] sm:$0xff] }
 0x296   : > { %2824 = vmatprep.subr.bf16.mxu1 %v2823_v0  ;;  %2952 = vmatprep.subr.bf16.mxu0 %v2951_v1  ;;  %v2971_v63 = vpack.c.bf16 %v1339_v60, %v1333_v58  ;;  %v2845_v0 = vpack.c.bf16 %v1336_v62, %v1330_v61  ;;  %v1332_v1 = vld [vmem:[#allocation11 + $0x4f0] sm:$0xff] }
 0x297   : > { %v2973_v3 = vpack.c.bf16 %v1338_v2, %v1332_v1 }
 0x299   : > { %2826 = vmatpush1.bf16.msra.mxu1 %v2825_v8  ;;  %2954 = vmatpush1.bf16.msra.mxu0 %v2953_v9  ;;  %v1351_v8 = vld [vmem:[#allocation11 + $0x588] sm:$0xff]  ;;  %v1342_v9 = vld [vmem:[#allocation11 + $0x540] sm:$0xff] }
 0x29a   : > { %2828 = vmatprep.subr.bf16.mxu1 %v2827_v13  ;;  %2956 = vmatprep.subr.bf16.mxu0 %v2955_v14  ;;  %v2975_v11 = vpack.c.bf16 %v1351_v8, %v1345_v6  ;;  %v2849_v13 = vpack.c.bf16 %v1348_v10, %v1342_v9  ;;  %v1344_v14 = vld [vmem:[#allocation11 + $0x550] sm:$0xff]  ;;  %v1374_v8 = vld [vmem:[#allocation11 + $0x640] sm:$0xff] }
 0x29b   : > { %v2977_v16 = vpack.c.bf16 %v1350_v15, %v1344_v14  ;;  %v1372_v6 = vld [vmem:[#allocation11 + $0x630] sm:$0xff]  ;;  %v1379_v14 = vld [vmem:[#allocation11 + $0x668] sm:$0xff] }
 0x29d   : > { %2830 = vmatpush1.bf16.msra.mxu1 %v2829_v21  ;;  %2958 = vmatpush1.bf16.msra.mxu0 %v2957_v23  ;;  %v1363_v21 = vld [vmem:[#allocation11 + $0x5e8] sm:$0xff]  ;;  %v1354_v23 = vld [vmem:[#allocation11 + $0x5a0] sm:$0xff] }
 0x29e   : > { %2832 = vmatprep.subr.bf16.mxu1 %v2831_v25  ;;  %2960 = vmatprep.subr.bf16.mxu0 %v2959_v26  ;;  %v2979_v25 = vpack.c.bf16 %v1363_v21, %v1357_v19  ;;  %v2853_v26 = vpack.c.bf16 %v1360_v24, %v1354_v23  ;;  %v1387_v19 = vld [vmem:[#allocation11 + $0x6a8] sm:$0xff]  ;;  %v1378_v24 = vld [vmem:[#allocation11 + $0x660] sm:$0xff] }
 0x2a1   : > { %2834 = vmatpush1.bf16.msra.mxu1 %v2833_v30  ;;  %2962 = vmatpush1.bf16.msra.mxu0 %v2961_v31  ;;  %v1367_v30 = vld [vmem:[#allocation11 + $0x608] sm:$0xff]  ;;  %v1373_v31 = vld [vmem:[#allocation11 + $0x638] sm:$0xff] }
 0x2a2   : > { %2836 = vmatprep.subr.bf16.mxu1 %v2835_v35  ;;  %2964 = vmatprep.subr.bf16.mxu0 %v2963_v39  ;;  %v2855_v33 = vpack.c.bf16 %v1373_v31, %v1367_v30  ;;  %v2983_v35 = vpack.c.bf16 %v1375_v34, %v1369_v32  ;;  %v2987_v30 = vpack.c.bf16 %v1387_v19, %v1381_v18  ;;  %v1397_v31 = vld [vmem:[#allocation11 + $0x6f8] sm:$0xff]  ;;  %v1447_v18 = vld [vmem:[#allocation11 + $0x888] sm:$0xff] }
 0x2a3   : > { %v1393_v32 = vld [vmem:[#allocation11 + $0x6d8] sm:$0xff] }
 0x2a5   : > { %2838 = vmatpush1.bf16.msra.mxu1 %v2837_v40  ;;  %2966 = vmatpush1.bf16.msra.mxu0 %v2965_v43 }
 0x2a6   : > { %2840 = vmatprep.subr.bf16.mxu1 %v2839_v46  ;;  %2968 = vmatprep.subr.bf16.mxu0 %v2967_v50 }
 0x2a9   : > { %2842 = vmatpush1.bf16.msra.mxu1 %v2841_v54  ;;  %2970 = vmatpush1.bf16.msra.mxu0 %v2969_v55 }
 0x2aa   : > { %2844 = vmatprep.subr.bf16.mxu1 %v2843_v59  ;;  %2972 = vmatprep.subr.bf16.mxu0 %v2971_v63 }
 0x2ad   : > { %2846 = vmatpush1.bf16.msra.mxu1 %v2845_v0  ;;  %2974 = vmatpush1.bf16.msra.mxu0 %v2973_v3  ;;  %v1366_v3 = vld [vmem:[#allocation11 + $0x600] sm:$0xff] }
 0x2ae   : > { %2848 = vmatprep.subr.bf16.mxu1 %v2847_v7  ;;  %2976 = vmatprep.subr.bf16.mxu0 %v2975_v11  ;;  %v1368_v7 = vld [vmem:[#allocation11 + $0x610] sm:$0xff]  ;;  %v2857_v15 = vpack.c.bf16 %v1372_v6, %v1366_v3  ;;  %v1433_v3 = vld [vmem:[#allocation11 + $0x818] sm:$0xff] }
 0x2b1   : > { %2850 = vmatpush1.bf16.msra.mxu1 %v2849_v13  ;;  %2978 = vmatpush1.bf16.msra.mxu0 %v2977_v16  ;;  %v2985_v16 = vpack.c.bf16 %v1374_v8, %v1368_v7  ;;  %v1426_v8 = vld [vmem:[#allocation11 + $0x7e0] sm:$0xff] }
 0x2b2   : > { %2852 = vmatprep.subr.bf16.mxu1 %v2851_v20  ;;  %2980 = vmatprep.subr.bf16.mxu0 %v2979_v25  ;;  %v1384_v25 = vld [vmem:[#allocation11 + $0x690] sm:$0xff] }
 0x2b3   : > { %v2861_v34 = vpack.c.bf16 %v1384_v25, %v1378_v24  ;;  %v1438_v25 = vld [vmem:[#allocation11 + $0x840] sm:$0xff] }
 0x2b5   : > { %2854 = vmatpush1.bf16.msra.mxu1 %v2853_v26  ;;  %2982 = vmatpush1.bf16.msra.mxu0 %v2981_v29  ;;  %v1391_v29 = vld [vmem:[#allocation11 + $0x6c8] sm:$0xff] }
 0x2b6   : > { %2856 = vmatprep.subr.bf16.mxu1 %v2855_v33  ;;  %2984 = vmatprep.subr.bf16.mxu0 %v2983_v35  ;;  %v1399_v33 = vld [vmem:[#allocation11 + $0x708] sm:$0xff]  ;;  %v2989_v35 = vpack.c.bf16 %v1386_v28, %v1380_v27  ;;  %v2863_v38 = vpack.c.bf16 %v1397_v31, %v1391_v29  ;;  %v1444_v27 = vld [vmem:[#allocation11 + $0x870] sm:$0xff] }
 0x2b7   : > { %v1451_v31 = vld [vmem:[#allocation11 + $0x8a8] sm:$0xff] }
 0x34a   : > { %v2747_v39 = vpop.f32.mrb[2].mxu0  ;;  %v2755_v40 = vpop.f32.mrb[0].mxu1 }
 0x34b   : > { %v1118_v42 = vadd.f32 %v2755_v40, %v2747_v39  ;;  %v1012_v43 = vpop.f32.mrb[3].mxu0  ;;  %v1112_v44 = vpop.f32.mrb[1].mxu1  ;;  %v2991_v39 = vpack.c.bf16 %v1399_v33, %v1393_v32  ;;  %v1392_v40 = vld [vmem:[#allocation11 + $0x6d0] sm:$0xff]  ;;  %v1457_v32 = vld [vmem:[#allocation11 + $0x8d8] sm:$0xff] }
 0x34c   : > { %v1113_v45 = vadd.f32 %v1112_v44, %v1012_v43  ;;  %v1409_v43 = vld [vmem:[#allocation11 + $0x758] sm:$0xff] }
 0x34d   : > { %v1139_v46 = vadd.f32 %v2568_v41, %v1118_v42  ;;  %v1403_v42 = vld [vmem:[#allocation11 + $0x728] sm:$0xff]  ;;  %v1405_v44 = vld [vmem:[#allocation11 + $0x738] sm:$0xff] }
 0x34e   : > { %v1138_v48 = vadd.f32 %v2568_v41, %v1113_v45  ;;  %v2750_v49 = vpop.f32.mrb[4].mxu0  ;;  %v2758_v50 = vpop.f32.mrb[2].mxu1  ;;  %v1411_v45 = vld [vmem:[#allocation11 + $0x768] sm:$0xff]  ;;  %v1453_v33 = vld [vmem:[#allocation11 + $0x8b8] sm:$0xff] }
 0x34f   : > { %v1143_v51 = vmax.f32 %v1139_v46, 0.0  ;;  %v1128_v52 = vadd.f32 %v2758_v50, %v2750_v49  ;;  %v1022_v53 = vpop.f32.mrb[5].mxu0  ;;  %v1122_v54 = vpop.f32.mrb[3].mxu1  ;;  %v2865_v46 = vpack.c.bf16 %v1396_v37, %v1390_v36  ;;  %v1408_v49 = vld [vmem:[#allocation11 + $0x750] sm:$0xff]  ;;  %v2867_v50 = vpack.c.bf16 %v1409_v43, %v1403_v42  ;;  %v1450_v37 = vld [vmem:[#allocation11 + $0x8a0] sm:$0xff]  ;;  %v1463_v43 = vld [vmem:[#allocation11 + $0x908] sm:$0xff] }
 0x350   : > { %v1142_v55 = vmax.f32 %v1138_v48, 0.0  ;;  %v1123_v56 = vadd.f32 %v1122_v54, %v1022_v53  ;;  %v1402_v48 = vld [vmem:[#allocation11 + $0x720] sm:$0xff]  ;;  %v1415_v54 = vld [vmem:[#allocation11 + $0x788] sm:$0xff] }
 0x351   : > { %v1159_v57 = vrot.slane %v1143_v51, %v1151_v47  ;;  %v1141_v58 = vadd.f32 %v2568_v41, %v1128_v52  ;;  %v2995_v51 = vpack.c.bf16 %v1411_v45, %v1405_v44  ;;  %v1404_v52 = vld [vmem:[#allocation11 + $0x730] sm:$0xff]  ;;  %v1410_v53 = vld [vmem:[#allocation11 + $0x760] sm:$0xff]  ;;  %v1469_v44 = vld [vmem:[#allocation11 + $0x938] sm:$0xff] }
 0x352   : > { %v1152_v59 = vrot.slane %v1142_v55, %v1151_v47  ;;  %v1140_v60 = vadd.f32 %v2568_v41, %v1123_v56  ;;  %v1398_v41 = vld [vmem:[#allocation11 + $0x700] sm:$0xff]  ;;  %v1421_v55 = vld [vmem:[#allocation11 + $0x7b8] sm:$0xff] }
 0x353   : > { %v1145_v61 = vmax.f32 %v1141_v58, 0.0  ;;  %v1417_v56 = vld [vmem:[#allocation11 + $0x798] sm:$0xff]  ;;  %v2869_v58 = vpack.c.bf16 %v1408_v49, %v1402_v48  ;;  %v1458_v42 = vld [vmem:[#allocation11 + $0x8e0] sm:$0xff] }
 0x354   : > { %v1594_v62 = vcombine.low %v1152_v59, %v1159_v57  ;;  %v1595_v63 = vcombine.high %v1152_v59, %v1159_v57  ;;  %v1144_v0 = vmax.f32 %v1140_v60, 0.0  ;;  %v1423_v57 = vld [vmem:[#allocation11 + $0x7c8] sm:$0xff]  ;;  %v2997_v59 = vpack.c.bf16 %v1410_v53, %v1404_v52  ;;  %v1414_v60 = vld [vmem:[#allocation11 + $0x780] sm:$0xff]  ;;  %v1465_v45 = vld [vmem:[#allocation11 + $0x918] sm:$0xff] }
 0x355   : > { %v1173_v1 = vrot.slane %v1145_v61, %v1151_v47  ;;  %v1420_v61 = vld [vmem:[#allocation11 + $0x7b0] sm:$0xff]  ;;  %v1462_v49 = vld [vmem:[#allocation11 + $0x900] sm:$0xff] }
 0x356   : > { %v1166_v2 = vrot.slane %v1144_v0, %v1151_v47  ;;  %v1604_v9 = vrot.slane %v1594_v62, %v4130_v22  ;;  %v1611_v11 = vrot.slane %v1595_v63, %v4130_v22  ;;  %v2993_v47 = vpack.c.bf16 %v1398_v41, %v1392_v40  ;;  %v1416_v0 = vld [vmem:[#allocation11 + $0x790] sm:$0xff] }
 0x357   : > { %v2871_v62 = vpack.c.bf16 %v1421_v55, %v1415_v54  ;;  %v2999_v63 = vpack.c.bf16 %v1423_v57, %v1417_v56  ;;  %v2873_v6 = vpack.c.bf16 %v1420_v61, %v1414_v60  ;;  %v1452_v41 = vld [vmem:[#allocation11 + $0x8b0] sm:$0xff]  ;;  %v1470_v54 = vld [vmem:[#allocation11 + $0x940] sm:$0xff]  ;;  %v1475_v55 = vld [vmem:[#allocation11 + $0x968] sm:$0xff] }
 0x358   : > { %v1596_v4 = vcombine.low %v1166_v2, %v1173_v1  ;;  %v1597_v5 = vcombine.high %v1166_v2, %v1173_v1  ;;  %v1422_v1 = vld [vmem:[#allocation11 + $0x7c0] sm:$0xff]  ;;  %v1427_v2 = vld [vmem:[#allocation11 + $0x7e8] sm:$0xff]  ;;  %v3013_v48 = vpack.c.bf16 %v1458_v42, %v1452_v41  ;;  %v1464_v53 = vld [vmem:[#allocation11 + $0x910] sm:$0xff] }
 0x359   : > { %v3001_v7 = vpack.c.bf16 %v1422_v1, %v1416_v0  ;;  %v1481_v56 = vld [vmem:[#allocation11 + $0x998] sm:$0xff]  ;;  %v3017_v60 = vpack.c.bf16 %v1470_v54, %v1464_v53  ;;  %v1474_v61 = vld [vmem:[#allocation11 + $0x960] sm:$0xff]  ;;  %v1476_v1 = vld [vmem:[#allocation11 + $0x970] sm:$0xff] }
 0x35a   : > { %v1618_v10 = vrot.slane %v1596_v4, %v4130_v22  ;;  %v1625_v13 = vrot.slane %v1597_v5, %v4130_v22  ;;  %v2859_v22 = vpack.c.bf16 %v1385_v17, %v1379_v14  ;;  %v1429_v4 = vld [vmem:[#allocation11 + $0x7f8] sm:$0xff]  ;;  %v1435_v5 = vld [vmem:[#allocation11 + $0x828] sm:$0xff]  ;;  %v1434_v14 = vld [vmem:[#allocation11 + $0x820] sm:$0xff] }
 0x35b   : > { %v1441_v17 = vld [vmem:[#allocation11 + $0x858] sm:$0xff]  ;;  %v1512_v42 = vld [vmem:[#allocation11 + $0xa90] sm:$0xff] }
 0x35c   : > { %v4189_v20 = vcombine.low %v1604_v9, %v1618_v10  ;;  %v4191_v21 = vcombine.high %v1604_v9, %v1618_v10  ;;  %v4193_v23 = vcombine.high %v1611_v11, %v1625_v13  ;;  %v4195_v26 = vcombine.low %v1611_v11, %v1625_v13  ;;  %v1432_v9 = vld [vmem:[#allocation11 + $0x810] sm:$0xff]  ;;  %v1477_v57 = vld [vmem:[#allocation11 + $0x978] sm:$0xff] }
 0x35d   : > { %v2875_v10 = vpack.c.bf16 %v1433_v3, %v1427_v2  ;;  %v3003_v11 = vpack.c.bf16 %v1435_v5, %v1429_v4  ;;  %v1428_v13 = vld [vmem:[#allocation11 + $0x7f0] sm:$0xff]  ;;  %v2877_v19 = vpack.c.bf16 %v1432_v9, %v1426_v8  ;;  %v3007_v29 = vpack.c.bf16 %v1447_v18, %v1441_v17  ;;  %v1482_v2 = vld [vmem:[#allocation11 + $0x9a0] sm:$0xff]  ;;  %v1487_v3 = vld [vmem:[#allocation11 + $0x9c8] sm:$0xff] }
 0x35e   : > { %1698 = vmatprep.mubr.f32.mxu1 %v4191_v21  ;;  %1840 = vmatprep.mubr.f32.mxu0 %v4191_v21  ;;  %v3005_v24 = vpack.c.bf16 %v1434_v14, %v1428_v13  ;;  %v1493_v4 = vld [vmem:[#allocation11 + $0x9f8] sm:$0xff]  ;;  %v3021_v8 = vpack.c.bf16 %v1482_v2, %v1476_v1  ;;  %v1486_v9 = vld [vmem:[#allocation11 + $0x9c0] sm:$0xff]  ;;  %v1488_v14 = vld [vmem:[#allocation11 + $0x9d0] sm:$0xff] }
 0x35f   : > { %1699 = vmatmul.mubr.f32.vlgmr.msra.gmra.mrb[4].mxu1 %v4189_v20  ;;  %1841 = vmatmul.mubr.f32.vlgmr.msra.gmra.mrb[6].mxu0 %v4189_v20  ;;  %v1489_v5 = vld [vmem:[#allocation11 + $0x9d8] sm:$0xff]  ;;  %v1524_v54 = vld [vmem:[#allocation11 + $0xaf0] sm:$0xff] }
 0x360   : > { %2858 = vmatpush1.bf16.msra.mxu1 %v2857_v15  ;;  %2986 = vmatpush1.bf16.msra.mxu0 %v2985_v16  ;;  %v1439_v15 = vld [vmem:[#allocation11 + $0x848] sm:$0xff]  ;;  %v1445_v16 = vld [vmem:[#allocation11 + $0x878] sm:$0xff]  ;;  %v1536_v2 = vld [vmem:[#allocation11 + $0xb50] sm:$0xff] }
 0x361   : > { %1769 = vmatprep.mubr.f32.mxu1 %v4193_v23  ;;  %1911 = vmatprep.mubr.f32.mxu0 %v4193_v23  ;;  %v2879_v28 = vpack.c.bf16 %v1445_v16, %v1439_v15  ;;  %v1494_v15 = vld [vmem:[#allocation11 + $0xa00] sm:$0xff]  ;;  %v1499_v16 = vld [vmem:[#allocation11 + $0xa28] sm:$0xff]  ;;  %v1505_v17 = vld [vmem:[#allocation11 + $0xa58] sm:$0xff] }
 0x362   : > { %2860 = vmatprep.subr.bf16.mxu1 %v2859_v22  ;;  %2988 = vmatprep.subr.bf16.mxu0 %v2987_v30  ;;  %v1440_v22 = vld [vmem:[#allocation11 + $0x850] sm:$0xff]  ;;  %v1446_v30 = vld [vmem:[#allocation11 + $0x880] sm:$0xff]  ;;  %v1501_v18 = vld [vmem:[#allocation11 + $0xa38] sm:$0xff] }
 0x363   : > { %v3009_v36 = vpack.c.bf16 %v1446_v30, %v1440_v22  ;;  %v1500_v30 = vld [vmem:[#allocation11 + $0xa30] sm:$0xff] }
 0x364   : > { %2862 = vmatpush1.bf16.msra.mxu1 %v2861_v34  ;;  %2990 = vmatpush1.bf16.msra.mxu0 %v2989_v35  ;;  %v1459_v34 = vld [vmem:[#allocation11 + $0x8e8] sm:$0xff]  ;;  %v2881_v35 = vpack.c.bf16 %v1444_v27, %v1438_v25  ;;  %v3025_v25 = vpack.c.bf16 %v1494_v15, %v1488_v14  ;;  %v1498_v27 = vld [vmem:[#allocation11 + $0xa20] sm:$0xff]  ;;  %v1552_v14 = vld [vmem:[#allocation11 + $0xbd0] sm:$0xff] }
 0x365   : > { %2864 = vmatprep.subr.bf16.mxu1 %v2863_v38  ;;  %2992 = vmatprep.subr.bf16.mxu0 %v2991_v39  ;;  %v1456_v38 = vld [vmem:[#allocation11 + $0x8d0] sm:$0xff]  ;;  %v2883_v39 = vpack.c.bf16 %v1457_v32, %v1451_v31  ;;  %v3011_v40 = vpack.c.bf16 %v1459_v34, %v1453_v33  ;;  %v1506_v31 = vld [vmem:[#allocation11 + $0xa60] sm:$0xff]  ;;  %v1511_v32 = vld [vmem:[#allocation11 + $0xa88] sm:$0xff] }
 0x366   : > { %v1517_v33 = vld [vmem:[#allocation11 + $0xab8] sm:$0xff]  ;;  %v1548_v15 = vld [vmem:[#allocation11 + $0xbb0] sm:$0xff] }
 0x367   : > { %v1513_v34 = vld [vmem:[#allocation11 + $0xa98] sm:$0xff] }
 0x368   : > { %2866 = vmatpush1.bf16.msra.mxu1 %v2865_v46  ;;  %2994 = vmatpush1.bf16.msra.mxu0 %v2993_v47  ;;  %v1471_v46 = vld [vmem:[#allocation11 + $0x948] sm:$0xff]  ;;  %v2885_v47 = vpack.c.bf16 %v1456_v38, %v1450_v37  ;;  %v3029_v37 = vpack.c.bf16 %v1506_v31, %v1500_v30  ;;  %v1510_v38 = vld [vmem:[#allocation11 + $0xa80] sm:$0xff] }
 0x369   : > { %2868 = vmatprep.subr.bf16.mxu1 %v2867_v50  ;;  %2996 = vmatprep.subr.bf16.mxu0 %v2995_v51  ;;  %v1468_v50 = vld [vmem:[#allocation11 + $0x930] sm:$0xff]  ;;  %v2887_v51 = vpack.c.bf16 %v1469_v44, %v1463_v43  ;;  %v3015_v52 = vpack.c.bf16 %v1471_v46, %v1465_v45  ;;  %v1518_v43 = vld [vmem:[#allocation11 + $0xac0] sm:$0xff]  ;;  %v1523_v44 = vld [vmem:[#allocation11 + $0xae8] sm:$0xff] }
 0x36a   : > { %v1529_v45 = vld [vmem:[#allocation11 + $0xb18] sm:$0xff] }
 0x36b   : > { %v1525_v46 = vld [vmem:[#allocation11 + $0xaf8] sm:$0xff] }
 0x36c   : > { %2870 = vmatpush1.bf16.msra.mxu1 %v2869_v58  ;;  %2998 = vmatpush1.bf16.msra.mxu0 %v2997_v59  ;;  %v1483_v58 = vld [vmem:[#allocation11 + $0x9a8] sm:$0xff]  ;;  %v2889_v59 = vpack.c.bf16 %v1468_v50, %v1462_v49  ;;  %v3033_v49 = vpack.c.bf16 %v1518_v43, %v1512_v42  ;;  %v1522_v50 = vld [vmem:[#allocation11 + $0xae0] sm:$0xff] }
 0x36d   : > { %2872 = vmatprep.subr.bf16.mxu1 %v2871_v62  ;;  %3000 = vmatprep.subr.bf16.mxu0 %v2999_v63  ;;  %v1480_v62 = vld [vmem:[#allocation11 + $0x990] sm:$0xff]  ;;  %v2891_v63 = vpack.c.bf16 %v1481_v56, %v1475_v55  ;;  %v3019_v0 = vpack.c.bf16 %v1483_v58, %v1477_v57  ;;  %v1530_v55 = vld [vmem:[#allocation11 + $0xb20] sm:$0xff]  ;;  %v1535_v56 = vld [vmem:[#allocation11 + $0xb48] sm:$0xff] }
 0x36e   : > { %v1541_v57 = vld [vmem:[#allocation11 + $0xb78] sm:$0xff]  ;;  %v2067_v43 = vld [vmem:[#allocation14 + $0x8] sm:$0xff] }
 0x36f   : > { %v1537_v58 = vld [vmem:[#allocation11 + $0xb58] sm:$0xff] }
 0x370   : > { %2874 = vmatpush1.bf16.msra.mxu1 %v2873_v6  ;;  %3002 = vmatpush1.bf16.msra.mxu0 %v3001_v7  ;;  %v1495_v6 = vld [vmem:[#allocation11 + $0xa08] sm:$0xff]  ;;  %v2893_v7 = vpack.c.bf16 %v1480_v62, %v1474_v61  ;;  %v3037_v61 = vpack.c.bf16 %v1530_v55, %v1524_v54  ;;  %v1534_v62 = vld [vmem:[#allocation11 + $0xb40] sm:$0xff] }
 0x371   : > { %2876 = vmatprep.subr.bf16.mxu1 %v2875_v10  ;;  %3004 = vmatprep.subr.bf16.mxu0 %v3003_v11  ;;  %v1492_v10 = vld [vmem:[#allocation11 + $0x9f0] sm:$0xff]  ;;  %v2895_v11 = vpack.c.bf16 %v1493_v4, %v1487_v3  ;;  %v3023_v13 = vpack.c.bf16 %v1495_v6, %v1489_v5  ;;  %v1542_v3 = vld [vmem:[#allocation11 + $0xb80] sm:$0xff]  ;;  %v1547_v4 = vld [vmem:[#allocation11 + $0xba8] sm:$0xff] }
 0x372   : > { %v1553_v5 = vld [vmem:[#allocation11 + $0xbd8] sm:$0xff]  ;;  %v2087_v54 = vld [vmem:[#allocation14 + $0xa8] sm:$0xff] }
 0x373   : > { %v1549_v6 = vld [vmem:[#allocation11 + $0xbb8] sm:$0xff] }
 0x374   : > { %2878 = vmatpush1.bf16.msra.mxu1 %v2877_v19  ;;  %3006 = vmatpush1.bf16.msra.mxu0 %v3005_v24  ;;  %v1507_v19 = vld [vmem:[#allocation11 + $0xa68] sm:$0xff]  ;;  %v2897_v24 = vpack.c.bf16 %v1492_v10, %v1486_v9  ;;  %v3041_v9 = vpack.c.bf16 %v1542_v3, %v1536_v2  ;;  %v1546_v10 = vld [vmem:[#allocation11 + $0xba0] sm:$0xff] }
 0x375   : > { %2880 = vmatprep.subr.bf16.mxu1 %v2879_v28  ;;  %3008 = vmatprep.subr.bf16.mxu0 %v3007_v29  ;;  %v1504_v28 = vld [vmem:[#allocation11 + $0xa50] sm:$0xff]  ;;  %v2899_v29 = vpack.c.bf16 %v1505_v17, %v1499_v16  ;;  %v3027_v22 = vpack.c.bf16 %v1507_v19, %v1501_v18  ;;  %v1554_v16 = vld [vmem:[#allocation11 + $0xbe0] sm:$0xff]  ;;  %v1179_v17 = vld [vmem:[#allocation11 + $0x28] sm:$0xff]  ;;  %v2917_v19 = vpack.c.bf16 %v1552_v14, %v1546_v10 }
 0x376   : > { %v1185_v18 = vld [vmem:[#allocation11 + $0x58] sm:$0xff]  ;;  %v2090_v10 = vld [vmem:[#allocation14 + $0xc0] sm:$0xff] }
 0x377   : > { %v1245_v14 = vld [vmem:[#allocation11 + $0x238] sm:$0xff] }
 0x378   : > { %2882 = vmatpush1.bf16.msra.mxu1 %v2881_v35  ;;  %3010 = vmatpush1.bf16.msra.mxu0 %v3009_v36  ;;  %v1519_v35 = vld [vmem:[#allocation11 + $0xac8] sm:$0xff]  ;;  %v2901_v36 = vpack.c.bf16 %v1504_v28, %v1498_v27  ;;  %v1178_v27 = vld [vmem:[#allocation11 + $0x20] sm:$0xff]  ;;  %v1184_v28 = vld [vmem:[#allocation11 + $0x50] sm:$0xff] }
 0x379   : > { %2884 = vmatprep.subr.bf16.mxu1 %v2883_v39  ;;  %3012 = vmatprep.subr.bf16.mxu0 %v3011_v40  ;;  %v1516_v39 = vld [vmem:[#allocation11 + $0xab0] sm:$0xff]  ;;  %v2903_v40 = vpack.c.bf16 %v1517_v33, %v1511_v32  ;;  %v3031_v41 = vpack.c.bf16 %v1519_v35, %v1513_v34  ;;  %v3049_v30 = vpack.c.bf16 %v1184_v28, %v1178_v27  ;;  %v1190_v32 = vld [vmem:[#allocation11 + $0x80] sm:$0xff]  ;;  %v1203_v34 = vld [vmem:[#allocation11 + $0xe8] sm:$0xff] }
 0x37a   : > { %v1196_v33 = vld [vmem:[#allocation11 + $0xb0] sm:$0xff]  ;;  %v1209_v35 = vld [vmem:[#allocation11 + $0x118] sm:$0xff] }
 0x37b   : > { %v1244_v27 = vld [vmem:[#allocation11 + $0x230] sm:$0xff] }
 0x37c   : > { %2886 = vmatpush1.bf16.msra.mxu1 %v2885_v47  ;;  %3014 = vmatpush1.bf16.msra.mxu0 %v3013_v48  ;;  %v1531_v47 = vld [vmem:[#allocation11 + $0xb28] sm:$0xff]  ;;  %v2905_v48 = vpack.c.bf16 %v1516_v39, %v1510_v38  ;;  %v2092_v28 = vld [vmem:[#allocation14 + $0xd0] sm:$0xff] }
 0x37d   : > { %2888 = vmatprep.subr.bf16.mxu1 %v2887_v51  ;;  %3016 = vmatprep.subr.bf16.mxu0 %v3015_v52  ;;  %v1528_v51 = vld [vmem:[#allocation11 + $0xb10] sm:$0xff]  ;;  %v2907_v52 = vpack.c.bf16 %v1529_v45, %v1523_v44  ;;  %v3035_v53 = vpack.c.bf16 %v1531_v47, %v1525_v46  ;;  %v2082_v38 = vld [vmem:[#allocation14 + $0x80] sm:$0xff]  ;;  %v2085_v45 = vld [vmem:[#allocation14 + $0x98] sm:$0xff]  ;;  %v3055_v46 = vpack.c.bf16 %v1209_v35, %v1203_v34 }
 0x37e   : > { %v2083_v39 = vld [vmem:[#allocation14 + $0x88] sm:$0xff]  ;;  %v2084_v44 = vld [vmem:[#allocation14 + $0x90] sm:$0xff] }
 0x37f   : > { %v3175_v42 = vpack.c.bf16 %v2083_v39, %v2082_v38  ;;  %v2076_v35 = vld [vmem:[#allocation14 + $0x50] sm:$0xff]  ;;  %v2094_v39 = vld [vmem:[#allocation14 + $0xe0] sm:$0xff] }
 0x380   : > { %2890 = vmatpush1.bf16.msra.mxu1 %v2889_v59  ;;  %3018 = vmatpush1.bf16.msra.mxu0 %v3017_v60  ;;  %v1543_v59 = vld [vmem:[#allocation11 + $0xb88] sm:$0xff]  ;;  %v2909_v60 = vpack.c.bf16 %v1528_v51, %v1522_v50  ;;  %v2069_v50 = vld [vmem:[#allocation14 + $0x18] sm:$0xff]  ;;  %v1256_v38 = vld [vmem:[#allocation11 + $0x290] sm:$0xff] }
 0x381   : > { %2892 = vmatprep.subr.bf16.mxu1 %v2891_v63  ;;  %3020 = vmatprep.subr.bf16.mxu0 %v3019_v0  ;;  %v1540_v63 = vld [vmem:[#allocation11 + $0xb70] sm:$0xff]  ;;  %v2911_v0 = vpack.c.bf16 %v1541_v57, %v1535_v56  ;;  %v3039_v1 = vpack.c.bf16 %v1543_v59, %v1537_v58  ;;  %v2086_v51 = vld [vmem:[#allocation14 + $0xa0] sm:$0xff] }
 0x382   : > { %v1214_v56 = vld [vmem:[#allocation11 + $0x140] sm:$0xff]  ;;  %v3183_v57 = vpack.c.bf16 %v2087_v54, %v2086_v51  ;;  %v2071_v59 = vld [vmem:[#allocation14 + $0x28] sm:$0xff] }
 0x383   : > { %v2070_v58 = vld [vmem:[#allocation14 + $0x20] sm:$0xff] }
 0x384   : > { %2894 = vmatpush1.bf16.msra.mxu1 %v2893_v7  ;;  %3022 = vmatpush1.bf16.msra.mxu0 %v3021_v8  ;;  %v1555_v7 = vld [vmem:[#allocation11 + $0xbe8] sm:$0xff]  ;;  %v2913_v8 = vpack.c.bf16 %v1540_v63, %v1534_v62  ;;  %v2088_v62 = vld [vmem:[#allocation14 + $0xb0] sm:$0xff]  ;;  %v2089_v63 = vld [vmem:[#allocation14 + $0xb8] sm:$0xff]  ;;  %v3185_v2 = vpack.c.bf16 %v2071_v59, %v2070_v58 }
 0x385   : > { %2896 = vmatprep.subr.bf16.mxu1 %v2895_v11  ;;  %3024 = vmatprep.subr.bf16.mxu0 %v3023_v13  ;;  %v2915_v11 = vpack.c.bf16 %v1553_v5, %v1547_v4  ;;  %v3043_v13 = vpack.c.bf16 %v1555_v7, %v1549_v6  ;;  %v1226_v4 = vld [vmem:[#allocation11 + $0x1a0] sm:$0xff]  ;;  %v3187_v5 = vpack.c.bf16 %v2089_v63, %v2088_v62  ;;  %v2072_v6 = vld [vmem:[#allocation14 + $0x30] sm:$0xff]  ;;  %v1275_v51 = vld [vmem:[#allocation11 + $0x328] sm:$0xff] }
 0x386   : > { %v2073_v7 = vld [vmem:[#allocation14 + $0x38] sm:$0xff]  ;;  %v1292_v62 = vld [vmem:[#allocation11 + $0x3b0] sm:$0xff]  ;;  %v1299_v63 = vld [vmem:[#allocation11 + $0x3e8] sm:$0xff] }
 0x387   : > { %v1293_v58 = vld [vmem:[#allocation11 + $0x3b8] sm:$0xff] }
 0x388   : > { %2898 = vmatpush1.bf16.msra.mxu1 %v2897_v24  ;;  %3026 = vmatpush1.bf16.msra.mxu0 %v3025_v25  ;;  %v3045_v24 = vpack.c.bf16 %v1554_v16, %v1548_v15  ;;  %v3047_v25 = vpack.c.bf16 %v1185_v18, %v1179_v17  ;;  %v3189_v15 = vpack.c.bf16 %v2073_v7, %v2072_v6  ;;  %v1238_v17 = vld [vmem:[#allocation11 + $0x200] sm:$0xff]  ;;  %v1317_v6 = vld [vmem:[#allocation11 + $0x478] sm:$0xff] }
 0x389   : > { %2900 = vmatprep.subr.bf16.mxu1 %v2899_v29  ;;  %3028 = vmatprep.subr.bf16.mxu0 %v3027_v22  ;;  %v1191_v29 = vld [vmem:[#allocation11 + $0x88] sm:$0xff]  ;;  %v1197_v22 = vld [vmem:[#allocation11 + $0xb8] sm:$0xff] }
 0x38a   : > { %v3051_v31 = vpack.c.bf16 %v1197_v22, %v1191_v29  ;;  %v2093_v29 = vld [vmem:[#allocation14 + $0xd8] sm:$0xff]  ;;  %v1251_v22 = vld [vmem:[#allocation11 + $0x268] sm:$0xff] }
 0x38b   : > { %v3195_v34 = vpack.c.bf16 %v2093_v29, %v2092_v28  ;;  %v1340_v28 = vld [vmem:[#allocation11 + $0x530] sm:$0xff]  ;;  %v1347_v29 = vld [vmem:[#allocation11 + $0x568] sm:$0xff] }
 0x38c   : > { %2902 = vmatpush1.bf16.msra.mxu1 %v2901_v36  ;;  %3030 = vmatpush1.bf16.msra.mxu0 %v3029_v37  ;;  %v1202_v36 = vld [vmem:[#allocation11 + $0xe0] sm:$0xff]  ;;  %v1208_v37 = vld [vmem:[#allocation11 + $0x110] sm:$0xff] }
 0x38d   : > { %2904 = vmatprep.subr.bf16.mxu1 %v2903_v40  ;;  %3032 = vmatprep.subr.bf16.mxu0 %v3031_v41  ;;  %v2066_v40 = vld [vmem:[#allocation14] sm:$0xff]  ;;  %v3053_v41 = vpack.c.bf16 %v1196_v33, %v1190_v32  ;;  %v3069_v32 = vpack.c.bf16 %v1244_v27, %v1238_v17  ;;  %v1328_v17 = vld [vmem:[#allocation11 + $0x4d0] sm:$0xff] }
 0x38e   : > { %v3177_v47 = vpack.c.bf16 %v2067_v43, %v2066_v40  ;;  %v1250_v33 = vld [vmem:[#allocation11 + $0x260] sm:$0xff]  ;;  %v2095_v40 = vld [vmem:[#allocation14 + $0xe8] sm:$0xff] }
 0x38f   : > { %v1334_v27 = vld [vmem:[#allocation11 + $0x500] sm:$0xff] }
 0x390   : > { %2906 = vmatpush1.bf16.msra.mxu1 %v2905_v48  ;;  %3034 = vmatpush1.bf16.msra.mxu0 %v3033_v49  ;;  %v3179_v48 = vpack.c.bf16 %v2085_v45, %v2084_v44  ;;  %v2068_v49 = vld [vmem:[#allocation14 + $0x10] sm:$0xff]  ;;  %v3073_v44 = vpack.c.bf16 %v1256_v38, %v1250_v33  ;;  %v3199_v45 = vpack.c.bf16 %v2095_v40, %v2094_v39  ;;  %v1358_v38 = vld [vmem:[#allocation11 + $0x5c0] sm:$0xff]  ;;  %v1371_v40 = vld [vmem:[#allocation11 + $0x628] sm:$0xff] }
 0x391   : > { %2908 = vmatprep.subr.bf16.mxu1 %v2907_v52  ;;  %3036 = vmatprep.subr.bf16.mxu0 %v3035_v53  ;;  %v1215_v52 = vld [vmem:[#allocation11 + $0x148] sm:$0xff]  ;;  %v1221_v53 = vld [vmem:[#allocation11 + $0x178] sm:$0xff]  ;;  %v3181_v55 = vpack.c.bf16 %v2069_v50, %v2068_v49  ;;  %v1262_v49 = vld [vmem:[#allocation11 + $0x2c0] sm:$0xff] }
 0x392   : > { %v1268_v50 = vld [vmem:[#allocation11 + $0x2f0] sm:$0xff] }
 0x393   : > { %v3077_v54 = vpack.c.bf16 %v1268_v50, %v1262_v49  ;;  %v1352_v33 = vld [vmem:[#allocation11 + $0x590] sm:$0xff]  ;;  %v1382_v50 = vld [vmem:[#allocation11 + $0x680] sm:$0xff] }
 0x394   : > { %2910 = vmatpush1.bf16.msra.mxu1 %v2909_v60  ;;  %3038 = vmatpush1.bf16.msra.mxu0 %v3037_v61  ;;  %v3059_v60 = vpack.c.bf16 %v1221_v53, %v1215_v52  ;;  %v1220_v61 = vld [vmem:[#allocation11 + $0x170] sm:$0xff]  ;;  %v1281_v52 = vld [vmem:[#allocation11 + $0x358] sm:$0xff] }
 0x395   : > { %2912 = vmatprep.subr.bf16.mxu1 %v2911_v0  ;;  %3040 = vmatprep.subr.bf16.mxu0 %v3039_v1  ;;  %v1227_v0 = vld [vmem:[#allocation11 + $0x1a8] sm:$0xff]  ;;  %v1233_v1 = vld [vmem:[#allocation11 + $0x1d8] sm:$0xff]  ;;  %v3061_v3 = vpack.c.bf16 %v1220_v61, %v1214_v56  ;;  %v1280_v56 = vld [vmem:[#allocation11 + $0x350] sm:$0xff] }
 0x396   : > { %v1286_v61 = vld [vmem:[#allocation11 + $0x380] sm:$0xff]  ;;  %v1364_v39 = vld [vmem:[#allocation11 + $0x5f0] sm:$0xff] }
 0x398   : > { %2914 = vmatpush1.bf16.msra.mxu1 %v2913_v8  ;;  %3042 = vmatpush1.bf16.msra.mxu0 %v3041_v9  ;;  %v3063_v8 = vpack.c.bf16 %v1233_v1, %v1227_v0  ;;  %v1232_v9 = vld [vmem:[#allocation11 + $0x1d0] sm:$0xff]  ;;  %v1305_v0 = vld [vmem:[#allocation11 + $0x418] sm:$0xff]  ;;  %v3085_v1 = vpack.c.bf16 %v1292_v62, %v1286_v61  ;;  %v1406_v61 = vld [vmem:[#allocation11 + $0x740] sm:$0xff] }
 0x399   : > { %2916 = vmatprep.subr.bf16.mxu1 %v2915_v11  ;;  %3044 = vmatprep.subr.bf16.mxu0 %v3043_v13  ;;  %v2091_v11 = vld [vmem:[#allocation14 + $0xc8] sm:$0xff]  ;;  %v3065_v16 = vpack.c.bf16 %v1232_v9, %v1226_v4  ;;  %v1310_v9 = vld [vmem:[#allocation11 + $0x440] sm:$0xff] }
 0x39a   : > { %v1239_v13 = vld [vmem:[#allocation11 + $0x208] sm:$0xff]  ;;  %v3191_v18 = vpack.c.bf16 %v2091_v11, %v2090_v10  ;;  %v1304_v4 = vld [vmem:[#allocation11 + $0x410] sm:$0xff] }
 0x39b   : > { %v1316_v10 = vld [vmem:[#allocation11 + $0x470] sm:$0xff]  ;;  %v1323_v11 = vld [vmem:[#allocation11 + $0x4a8] sm:$0xff] }
 0x39c   : > { %2918 = vmatpush1.bf16.msra.mxu1 %v2917_v19  ;;  %3046 = vmatpush1.bf16.msra.mxu0 %v3045_v24  ;;  %v2074_v19 = vld [vmem:[#allocation14 + $0x40] sm:$0xff]  ;;  %v2075_v24 = vld [vmem:[#allocation14 + $0x48] sm:$0xff] }
 0x39d   : > { %3048 = vmatprep.subr.bf16.mxu1 %v3047_v25  ;;  %3176 = vmatprep.subr.bf16.mxu0 %v3175_v42  ;;  %v3067_v25 = vpack.c.bf16 %v1245_v14, %v1239_v13  ;;  %v1269_v42 = vld [vmem:[#allocation11 + $0x2f8] sm:$0xff]  ;;  %v3093_v14 = vpack.c.bf16 %v1316_v10, %v1310_v9  ;;  %v1412_v62 = vld [vmem:[#allocation11 + $0x770] sm:$0xff]  ;;  %v1443_v9 = vld [vmem:[#allocation11 + $0x868] sm:$0xff] }
 0x39e   : > { %v1329_v13 = vld [vmem:[#allocation11 + $0x4d8] sm:$0xff] }
 0x39f   : > { %1770 = vmatmul.mubr.f32.vlgmr.msra.gmra.mrb[4].mxu1 %v4195_v26  ;;  %1912 = vmatmul.mubr.f32.vlgmr.msra.gmra.mrb[6].mxu0 %v4195_v26  ;;  %v1449_v10 = vld [vmem:[#allocation11 + $0x898] sm:$0xff] }
 0x3a0   : > { %3050 = vmatpush1.bf16.msra.mxu1 %v3049_v30  ;;  %1982 = vmatprep.mubr.f32.mxu1 %v4191_v21  ;;  %v3057_v21 = vpack.c.bf16 %v1208_v37, %v1202_v36  ;;  %v1257_v30 = vld [vmem:[#allocation11 + $0x298] sm:$0xff] }
 0x3a1   : > { %3052 = vmatprep.subr.bf16.mxu1 %v3051_v31  ;;  %3178 = vmatpush3.bf16.msra.mxu0 %v3177_v47  ;;  %v3193_v31 = vpack.c.bf16 %v2075_v24, %v2074_v19  ;;  %v2077_v36 = vld [vmem:[#allocation14 + $0x58] sm:$0xff]  ;;  %v3071_v37 = vpack.c.bf16 %v1257_v30, %v1251_v22  ;;  %v2079_v47 = vld [vmem:[#allocation14 + $0x68] sm:$0xff]  ;;  %v3101_v30 = vpack.c.bf16 %v1340_v28, %v1334_v27 }
 0x3a2   : > { %3180 = vmatprep.subr.bf16.mxu0 %v3179_v48  ;;  %v3197_v43 = vpack.c.bf16 %v2077_v36, %v2076_v35  ;;  %v1341_v19 = vld [vmem:[#allocation11 + $0x538] sm:$0xff] }
 0x3a3   : > { %v1353_v22 = vld [vmem:[#allocation11 + $0x598] sm:$0xff] }
 0x3a4   : > { %3054 = vmatpush1.bf16.msra.mxu1 %v3053_v41  ;;  %v1263_v41 = vld [vmem:[#allocation11 + $0x2c8] sm:$0xff]  ;;  %v1365_v35 = vld [vmem:[#allocation11 + $0x5f8] sm:$0xff] }
 0x3a5   : > { %3056 = vmatprep.subr.bf16.mxu1 %v3055_v46  ;;  %3182 = vmatpush3.bf16.msra.mxu0 %v3181_v55  ;;  %v2078_v46 = vld [vmem:[#allocation14 + $0x60] sm:$0xff]  ;;  %v3075_v48 = vpack.c.bf16 %v1269_v42, %v1263_v41  ;;  %v3079_v55 = vpack.c.bf16 %v1281_v52, %v1275_v51  ;;  %v1377_v41 = vld [vmem:[#allocation11 + $0x658] sm:$0xff]  ;;  %v3109_v42 = vpack.c.bf16 %v1364_v39, %v1358_v38  ;;  %v1388_v51 = vld [vmem:[#allocation11 + $0x6b0] sm:$0xff] }
 0x3a6   : > { %3184 = vmatprep.subr.bf16.mxu0 %v3183_v57  ;;  %v3201_v53 = vpack.c.bf16 %v2079_v47, %v2078_v46  ;;  %v1287_v57 = vld [vmem:[#allocation11 + $0x388] sm:$0xff]  ;;  %v1389_v47 = vld [vmem:[#allocation11 + $0x6b8] sm:$0xff]  ;;  %v1466_v39 = vld [vmem:[#allocation11 + $0x920] sm:$0xff] }
 0x3a7   : > { %v1383_v46 = vld [vmem:[#allocation11 + $0x688] sm:$0xff]  ;;  %v2081_v27 = vld [vmem:[#allocation14 + $0x78] sm:$0xff] }
 0x3a8   : > { %3058 = vmatpush1.bf16.msra.mxu1 %v3057_v21  ;;  %v1274_v21 = vld [vmem:[#allocation11 + $0x320] sm:$0xff]  ;;  %v3115_v49 = vpack.c.bf16 %v1389_v47, %v1383_v46  ;;  %v1395_v52 = vld [vmem:[#allocation11 + $0x6e8] sm:$0xff]  ;;  %v1484_v46 = vld [vmem:[#allocation11 + $0x9b0] sm:$0xff] }
 0x3a9   : > { %3060 = vmatprep.subr.bf16.mxu1 %v3059_v60  ;;  %3186 = vmatpush3.bf16.msra.mxu0 %v3185_v2  ;;  %v3081_v59 = vpack.c.bf16 %v1280_v56, %v1274_v21  ;;  %v3083_v60 = vpack.c.bf16 %v1293_v58, %v1287_v57  ;;  %v3087_v2 = vpack.c.bf16 %v1305_v0, %v1299_v63  ;;  %v1394_v21 = vld [vmem:[#allocation11 + $0x6e0] sm:$0xff]  ;;  %v1400_v56 = vld [vmem:[#allocation11 + $0x710] sm:$0xff]  ;;  %v1407_v57 = vld [vmem:[#allocation11 + $0x748] sm:$0xff] }
 0x3aa   : > { %3188 = vmatprep.subr.bf16.mxu0 %v3187_v5  ;;  %v1311_v5 = vld [vmem:[#allocation11 + $0x448] sm:$0xff]  ;;  %v1413_v58 = vld [vmem:[#allocation11 + $0x778] sm:$0xff] }
 0x3ab   : > { %v1419_v63 = vld [vmem:[#allocation11 + $0x7a8] sm:$0xff]  ;;  %v1425_v0 = vld [vmem:[#allocation11 + $0x7d8] sm:$0xff] }
 0x3ac   : > { %3062 = vmatpush1.bf16.msra.mxu1 %v3061_v3  ;;  %v1298_v3 = vld [vmem:[#allocation11 + $0x3e0] sm:$0xff]  ;;  %v1491_v47 = vld [vmem:[#allocation11 + $0x9e8] sm:$0xff] }
 0x3ad   : > { %3064 = vmatprep.subr.bf16.mxu1 %v3063_v8  ;;  %3190 = vmatpush3.bf16.msra.mxu0 %v3189_v15  ;;  %v3089_v7 = vpack.c.bf16 %v1304_v4, %v1298_v3  ;;  %v3091_v8 = vpack.c.bf16 %v1317_v6, %v1311_v5  ;;  %v3095_v15 = vpack.c.bf16 %v1329_v13, %v1323_v11  ;;  %v1431_v3 = vld [vmem:[#allocation11 + $0x808] sm:$0xff]  ;;  %v1437_v4 = vld [vmem:[#allocation11 + $0x838] sm:$0xff]  ;;  %v1442_v13 = vld [vmem:[#allocation11 + $0x860] sm:$0xff] }
 0x3ae   : > { %3192 = vmatprep.subr.bf16.mxu0 %v3191_v18  ;;  %v1335_v18 = vld [vmem:[#allocation11 + $0x508] sm:$0xff]  ;;  %v3131_v6 = vpack.c.bf16 %v1437_v4, %v1431_v3  ;;  %v1532_v3 = vld [vmem:[#allocation11 + $0xb30] sm:$0xff] }
 0x3af   : > { %v1539_v4 = vld [vmem:[#allocation11 + $0xb68] sm:$0xff] }
 0x3b0   : > { %3066 = vmatpush1.bf16.msra.mxu1 %v3065_v16  ;;  %v1322_v16 = vld [vmem:[#allocation11 + $0x4a0] sm:$0xff] }
 0x3b1   : > { %3068 = vmatprep.subr.bf16.mxu1 %v3067_v25  ;;  %3194 = vmatpush3.bf16.msra.mxu0 %v3193_v31  ;;  %v3097_v24 = vpack.c.bf16 %v1328_v17, %v1322_v16  ;;  %v3099_v25 = vpack.c.bf16 %v1341_v19, %v1335_v18  ;;  %v3103_v31 = vpack.c.bf16 %v1353_v22, %v1347_v29  ;;  %v1455_v16 = vld [vmem:[#allocation11 + $0x8c8] sm:$0xff]  ;;  %v2096_v17 = vld [vmem:[#allocation14 + $0xf0] sm:$0xff]  ;;  %v2097_v18 = vld [vmem:[#allocation14 + $0xf8] sm:$0xff] }
 0x3b2   : > { %3196 = vmatprep.subr.bf16.mxu0 %v3195_v34  ;;  %v1359_v34 = vld [vmem:[#allocation11 + $0x5c8] sm:$0xff]  ;;  %v1461_v19 = vld [vmem:[#allocation11 + $0x8f8] sm:$0xff]  ;;  %v1454_v22 = vld [vmem:[#allocation11 + $0x8c0] sm:$0xff] }
 0x3b4   : > { %3070 = vmatpush1.bf16.msra.mxu1 %v3069_v32  ;;  %v1346_v32 = vld [vmem:[#allocation11 + $0x560] sm:$0xff] }
 0x3b5   : > { %3072 = vmatprep.subr.bf16.mxu1 %v3071_v37  ;;  %3198 = vmatpush3.bf16.msra.mxu0 %v3197_v43  ;;  %v3105_v36 = vpack.c.bf16 %v1352_v33, %v1346_v32  ;;  %v3107_v37 = vpack.c.bf16 %v1365_v35, %v1359_v34  ;;  %v3111_v43 = vpack.c.bf16 %v1377_v41, %v1371_v40  ;;  %v2114_v32 = vld [vmem:[#allocation14 + $0x180] sm:$0xff]  ;;  %v2115_v33 = vld [vmem:[#allocation14 + $0x188] sm:$0xff]  ;;  %v1473_v35 = vld [vmem:[#allocation11 + $0x958] sm:$0xff] }
 0x3b6   : > { %3200 = vmatprep.subr.bf16.mxu0 %v3199_v45  ;;  %v1376_v45 = vld [vmem:[#allocation11 + $0x650] sm:$0xff]  ;;  %v1467_v34 = vld [vmem:[#allocation11 + $0x928] sm:$0xff] }
 0x3b7   : > { %v3143_v38 = vpack.c.bf16 %v1473_v35, %v1467_v34  ;;  %v1472_v40 = vld [vmem:[#allocation11 + $0x950] sm:$0xff]  ;;  %v1479_v41 = vld [vmem:[#allocation11 + $0x988] sm:$0xff] }
 0x3b8   : > { %3074 = vmatpush1.bf16.msra.mxu1 %v3073_v44  ;;  %v1370_v44 = vld [vmem:[#allocation11 + $0x620] sm:$0xff]  ;;  %v2099_v34 = vld [vmem:[#allocation14 + $0x108] sm:$0xff] }
 0x3b9   : > { %3076 = vmatprep.subr.bf16.mxu1 %v3075_v48  ;;  %3202 = vmatpush3.bf16.msra.mxu0 %v3201_v53  ;;  %v3113_v48 = vpack.c.bf16 %v1376_v45, %v1370_v44  ;;  %v1401_v53 = vld [vmem:[#allocation11 + $0x718] sm:$0xff]  ;;  %v1478_v45 = vld [vmem:[#allocation11 + $0x980] sm:$0xff] }
 0x3bc   : > { %3078 = vmatpush1.bf16.msra.mxu1 %v3077_v54  ;;  %v3117_v54 = vpack.c.bf16 %v1388_v51, %v1382_v50  ;;  %v1490_v51 = vld [vmem:[#allocation11 + $0x9e0] sm:$0xff] }
 0x3bd   : > { %3080 = vmatprep.subr.bf16.mxu1 %v3079_v55  ;;  %v3119_v55 = vpack.c.bf16 %v1401_v53, %v1395_v52  ;;  %v1496_v52 = vld [vmem:[#allocation11 + $0xa10] sm:$0xff]  ;;  %v1503_v53 = vld [vmem:[#allocation11 + $0xa48] sm:$0xff] }
 0x3c0   : > { %3082 = vmatpush1.bf16.msra.mxu1 %v3081_v59  ;;  %v3121_v59 = vpack.c.bf16 %v1400_v56, %v1394_v21  ;;  %v1502_v56 = vld [vmem:[#allocation11 + $0xa40] sm:$0xff] }
 0x3c1   : > { %3084 = vmatprep.subr.bf16.mxu1 %v3083_v60  ;;  %v3123_v60 = vpack.c.bf16 %v1413_v58, %v1407_v57  ;;  %v1508_v57 = vld [vmem:[#allocation11 + $0xa70] sm:$0xff]  ;;  %v1515_v58 = vld [vmem:[#allocation11 + $0xaa8] sm:$0xff] }
 0x3c4   : > { %3086 = vmatpush1.bf16.msra.mxu1 %v3085_v1  ;;  %v3127_v1 = vpack.c.bf16 %v1425_v0, %v1419_v63  ;;  %v1520_v63 = vld [vmem:[#allocation11 + $0xad0] sm:$0xff]  ;;  %v1527_v0 = vld [vmem:[#allocation11 + $0xb08] sm:$0xff] }
 0x3c5   : > { %3088 = vmatprep.subr.bf16.mxu1 %v3087_v2  ;;  %v1424_v2 = vld [vmem:[#allocation11 + $0x7d0] sm:$0xff] }
 0x3c8   : > { %3090 = vmatpush1.bf16.msra.mxu1 %v3089_v7  ;;  %v1430_v7 = vld [vmem:[#allocation11 + $0x800] sm:$0xff] }
 0x3c9   : > { %3092 = vmatprep.subr.bf16.mxu1 %v3091_v8  ;;  %v1436_v8 = vld [vmem:[#allocation11 + $0x830] sm:$0xff] }
 0x3ca   : > { %v3133_v11 = vpack.c.bf16 %v1436_v8, %v1430_v7  ;;  %v1538_v8 = vld [vmem:[#allocation11 + $0xb60] sm:$0xff] }
 0x3cc   : > { %3094 = vmatpush1.bf16.msra.mxu1 %v3093_v14  ;;  %v1448_v14 = vld [vmem:[#allocation11 + $0x890] sm:$0xff] }
 0x3cd   : > { %3096 = vmatprep.subr.bf16.mxu1 %v3095_v15  ;;  %v3135_v15 = vpack.c.bf16 %v1449_v10, %v1443_v9  ;;  %v3137_v29 = vpack.c.bf16 %v1448_v14, %v1442_v13  ;;  %v1544_v9 = vld [vmem:[#allocation11 + $0xb90] sm:$0xff]  ;;  %v1551_v10 = vld [vmem:[#allocation11 + $0xbc8] sm:$0xff] }
 0x3ce   : > { %v3169_v13 = vpack.c.bf16 %v1544_v9, %v1538_v8  ;;  %v2110_v8 = vld [vmem:[#allocation14 + $0x160] sm:$0xff]  ;;  %v2111_v9 = vld [vmem:[#allocation14 + $0x168] sm:$0xff] }
 0x3d0   : > { %3098 = vmatpush1.bf16.msra.mxu1 %v3097_v24  ;;  %v3203_v24 = vpack.c.bf16 %v2097_v18, %v2096_v17  ;;  %v1562_v18 = vsub.s32 0, %v4117_v12 }
 0x3d1   : > { %3100 = vmatprep.subr.bf16.mxu1 %v3099_v25  ;;  %v2080_v25 = vld [vmem:[#allocation14 + $0x70] sm:$0xff] }
 0x3d2   : > { %v3205_v28 = vpack.c.bf16 %v2081_v27, %v2080_v25  ;;  %3204 = vmatprep.subr.bf16.mxu0 %v3203_v24  ;;  %v1566_v24 = vsub.s32 1, %v4117_v12  ;;  %v1574_v25 = vsub.s32 3, %v4117_v12 }
 0x3d4   : > { %3102 = vmatpush1.bf16.msra.mxu1 %v3101_v30  ;;  %v3139_v30 = vpack.c.bf16 %v1461_v19, %v1455_v16  ;;  %3206 = vmatpush3.bf16.msra.mxu0 %v3205_v28  ;;  %v1556_v16 = vld [vmem:[#allocation11 + $0xbf0] sm:$0xff]  ;;  %v4210_v19 = vld [vmem:[#allocation12] sm:$0x3f] }
 0x3d5   : > { %3104 = vmatprep.subr.bf16.mxu1 %v3103_v31  ;;  %v1460_v31 = vld [vmem:[#allocation11 + $0x8f0] sm:$0xff]  ;;  %v1563_v27 = vrot.slane %v4210_v19, %v1562_v18  ;;  %v1567_v28 = vrot.slane %v4210_v19, %v1566_v24  ;;  %v2146_v18 = vld [vmem:[#allocation14 + $0x280] sm:$0xff] }
 0x3d6   : > { %v2147_v24 = vld [vmem:[#allocation14 + $0x288] sm:$0xff] }
 0x3d8   : > { %3106 = vmatpush1.bf16.msra.mxu1 %v3105_v36  ;;  %v3207_v36 = vpack.c.bf16 %v2115_v33, %v2114_v32  ;;  %v2098_v33 = vld [vmem:[#allocation14 + $0x100] sm:$0xff] }
 0x3d9   : > { %3108 = vmatprep.subr.bf16.mxu1 %v3107_v37  ;;  %v3141_v37 = vpack.c.bf16 %v1460_v31, %v1454_v22 }
 0x3da   : > { %3208 = vmatprep.subr.bf16.mxu0 %v3207_v36 }
 0x3dc   : > { %3110 = vmatpush1.bf16.msra.mxu1 %v3109_v42  ;;  %v1485_v42 = vld [vmem:[#allocation11 + $0x9b8] sm:$0xff] }
 0x3dd   : > { %3112 = vmatprep.subr.bf16.mxu1 %v3111_v43  ;;  %v3145_v43 = vpack.c.bf16 %v1472_v40, %v1466_v39  ;;  %v3147_v44 = vpack.c.bf16 %v1485_v42, %v1479_v41  ;;  %v3209_v40 = vpack.c.bf16 %v2099_v34, %v2098_v33 }
 0x3df   : > { %1983 = vmatmul.mubr.f32.vlgmr.msra.gmra.mrb[6].mxu1 %v4189_v20  ;;  %v3125_v20 = vpack.c.bf16 %v1412_v62, %v1406_v61  ;;  %v1514_v62 = vld [vmem:[#allocation11 + $0xaa0] sm:$0xff] }
 0x3e0   : > { %3114 = vmatpush1.bf16.msra.mxu1 %v3113_v48  ;;  %2053 = vmatprep.mubr.f32.mxu1 %v4193_v23  ;;  %v1418_v23 = vld [vmem:[#allocation11 + $0x7a0] sm:$0xff]  ;;  %v1497_v48 = vld [vmem:[#allocation11 + $0xa18] sm:$0xff] }
 0x3e1   : > { %3116 = vmatprep.subr.bf16.mxu1 %v3115_v49  ;;  %v3129_v5 = vpack.c.bf16 %v1424_v2, %v1418_v23  ;;  %v3149_v49 = vpack.c.bf16 %v1484_v46, %v1478_v45  ;;  %v3151_v50 = vpack.c.bf16 %v1497_v48, %v1491_v47  ;;  %v1526_v2 = vld [vmem:[#allocation11 + $0xb00] sm:$0xff]  ;;  %v2119_v47 = vld [vmem:[#allocation14 + $0x1a8] sm:$0xff] }
 0x3e2   : > { %v2118_v46 = vld [vmem:[#allocation14 + $0x1a0] sm:$0xff] }
 0x3e4   : > { %3118 = vmatpush1.bf16.msra.mxu1 %v3117_v54  ;;  %v1509_v54 = vld [vmem:[#allocation11 + $0xa78] sm:$0xff] }
 0x3e5   : > { %3120 = vmatprep.subr.bf16.mxu1 %v3119_v55  ;;  %v3153_v55 = vpack.c.bf16 %v1496_v52, %v1490_v51  ;;  %v3155_v21 = vpack.c.bf16 %v1509_v54, %v1503_v53  ;;  %v2103_v51 = vld [vmem:[#allocation14 + $0x128] sm:$0xff]  ;;  %v2120_v52 = vld [vmem:[#allocation14 + $0x1b0] sm:$0xff]  ;;  %v2121_v53 = vld [vmem:[#allocation14 + $0x1b8] sm:$0xff] }
 0x3e8   : > { %3122 = vmatpush1.bf16.msra.mxu1 %v3121_v59  ;;  %v1521_v59 = vld [vmem:[#allocation11 + $0xad8] sm:$0xff] }
 0x3e9   : > { %3124 = vmatprep.subr.bf16.mxu1 %v3123_v60  ;;  %v3157_v60 = vpack.c.bf16 %v1508_v57, %v1502_v56  ;;  %v3159_v61 = vpack.c.bf16 %v1521_v59, %v1515_v58  ;;  %v2105_v56 = vld [vmem:[#allocation14 + $0x138] sm:$0xff]  ;;  %v2122_v57 = vld [vmem:[#allocation14 + $0x1c0] sm:$0xff]  ;;  %v2123_v58 = vld [vmem:[#allocation14 + $0x1c8] sm:$0xff] }
 0x3ec   : > { %3126 = vmatpush1.bf16.msra.mxu1 %v3125_v20  ;;  %v1533_v20 = vld [vmem:[#allocation11 + $0xb38] sm:$0xff] }
 0x3ed   : > { %3128 = vmatprep.subr.bf16.mxu1 %v3127_v1  ;;  %v3161_v1 = vpack.c.bf16 %v1520_v63, %v1514_v62  ;;  %v3163_v23 = vpack.c.bf16 %v1533_v20, %v1527_v0  ;;  %v2107_v62 = vld [vmem:[#allocation14 + $0x148] sm:$0xff]  ;;  %v2124_v63 = vld [vmem:[#allocation14 + $0x1d0] sm:$0xff]  ;;  %v2125_v0 = vld [vmem:[#allocation14 + $0x1d8] sm:$0xff] }
 0x3f0   : > { %3130 = vmatpush1.bf16.msra.mxu1 %v3129_v5  ;;  %v1545_v5 = vld [vmem:[#allocation11 + $0xb98] sm:$0xff] }
 0x3f1   : > { %3132 = vmatprep.subr.bf16.mxu1 %v3131_v6  ;;  %v3165_v6 = vpack.c.bf16 %v1532_v3, %v1526_v2  ;;  %v3167_v7 = vpack.c.bf16 %v1545_v5, %v1539_v4  ;;  %v2109_v2 = vld [vmem:[#allocation14 + $0x158] sm:$0xff]  ;;  %v2126_v3 = vld [vmem:[#allocation14 + $0x1e0] sm:$0xff]  ;;  %v2127_v4 = vld [vmem:[#allocation14 + $0x1e8] sm:$0xff] }
 0x3f4   : > { %3134 = vmatpush1.bf16.msra.mxu1 %v3133_v11  ;;  %v1557_v11 = vld [vmem:[#allocation11 + $0xbf8] sm:$0xff] }
 0x3f5   : > { %3136 = vmatprep.subr.bf16.mxu1 %v3135_v15  ;;  %v3171_v14 = vpack.c.bf16 %v1557_v11, %v1551_v10  ;;  %v1550_v15 = vld [vmem:[#allocation11 + $0xbc0] sm:$0xff]  ;;  %v2128_v10 = vld [vmem:[#allocation14 + $0x1f0] sm:$0xff] }
 0x3f6   : > { %v3173_v17 = vpack.c.bf16 %v1556_v16, %v1550_v15  ;;  %v2129_v11 = vld [vmem:[#allocation14 + $0x1f8] sm:$0xff]  ;;  %v2112_v16 = vld [vmem:[#allocation14 + $0x170] sm:$0xff] }
 0x3f7   : > { %v3235_v15 = vpack.c.bf16 %v2129_v11, %v2128_v10 }
 0x3f8   : > { %3138 = vmatpush1.bf16.msra.mxu1 %v3137_v29  ;;  %v1575_v29 = vrot.slane %v4210_v19, %v1574_v25 }
 0x3f9   : > { %3140 = vmatprep.subr.bf16.mxu1 %v3139_v30 }
 0x3fc   : > { %3142 = vmatpush1.bf16.msra.mxu1 %v3141_v37  ;;  %v2116_v37 = vld [vmem:[#allocation14 + $0x190] sm:$0xff] }
 0x3fd   : > { %3144 = vmatprep.subr.bf16.mxu1 %v3143_v38  ;;  %v2117_v38 = vld [vmem:[#allocation14 + $0x198] sm:$0xff] }
 0x3fe   : > { %v3211_v42 = vpack.c.bf16 %v2117_v38, %v2116_v37  ;;  %v2150_v37 = vld [vmem:[#allocation14 + $0x2a0] sm:$0xff]  ;;  %v2151_v38 = vld [vmem:[#allocation14 + $0x2a8] sm:$0xff] }
 0x400   : > { %3146 = vmatpush1.bf16.msra.mxu1 %v3145_v43  ;;  %v2100_v43 = vld [vmem:[#allocation14 + $0x110] sm:$0xff] }
 0x401   : > { %3148 = vmatprep.subr.bf16.mxu1 %v3147_v44  ;;  %v2101_v44 = vld [vmem:[#allocation14 + $0x118] sm:$0xff] }
 0x402   : > { %v3213_v48 = vpack.c.bf16 %v2101_v44, %v2100_v43  ;;  %v2153_v43 = vld [vmem:[#allocation14 + $0x2b8] sm:$0xff] }
 0x404   : > { %3150 = vmatpush1.bf16.msra.mxu1 %v3149_v49  ;;  %v3215_v49 = vpack.c.bf16 %v2119_v47, %v2118_v46  ;;  %v2136_v46 = vld [vmem:[#allocation14 + $0x230] sm:$0xff]  ;;  %v2137_v47 = vld [vmem:[#allocation14 + $0x238] sm:$0xff] }
 0x405   : > { %3152 = vmatprep.subr.bf16.mxu1 %v3151_v50  ;;  %v2102_v50 = vld [vmem:[#allocation14 + $0x120] sm:$0xff] }
 0x406   : > { %v3217_v54 = vpack.c.bf16 %v2103_v51, %v2102_v50  ;;  %v3253_v50 = vpack.c.bf16 %v2137_v47, %v2136_v46 }
 0x408   : > { %3154 = vmatpush1.bf16.msra.mxu1 %v3153_v55  ;;  %v3219_v55 = vpack.c.bf16 %v2121_v53, %v2120_v52  ;;  %v2138_v52 = vld [vmem:[#allocation14 + $0x240] sm:$0xff]  ;;  %v2139_v53 = vld [vmem:[#allocation14 + $0x248] sm:$0xff] }
 0x409   : > { %3156 = vmatprep.subr.bf16.mxu1 %v3155_v21  ;;  %v2104_v21 = vld [vmem:[#allocation14 + $0x130] sm:$0xff] }
 0x40a   : > { %v3221_v59 = vpack.c.bf16 %v2105_v56, %v2104_v21  ;;  %v3257_v21 = vpack.c.bf16 %v2139_v53, %v2138_v52 }
 0x40c   : > { %3158 = vmatpush1.bf16.msra.mxu1 %v3157_v60  ;;  %v3223_v60 = vpack.c.bf16 %v2123_v58, %v2122_v57  ;;  %v2140_v57 = vld [vmem:[#allocation14 + $0x250] sm:$0xff]  ;;  %v2141_v58 = vld [vmem:[#allocation14 + $0x258] sm:$0xff] }
 0x40d   : > { %3160 = vmatprep.subr.bf16.mxu1 %v3159_v61  ;;  %v2106_v61 = vld [vmem:[#allocation14 + $0x140] sm:$0xff] }
 0x40e   : > { %v3225_v20 = vpack.c.bf16 %v2107_v62, %v2106_v61  ;;  %v3261_v61 = vpack.c.bf16 %v2141_v58, %v2140_v57 }
 0x410   : > { %3162 = vmatpush1.bf16.msra.mxu1 %v3161_v1  ;;  %v3227_v1 = vpack.c.bf16 %v2125_v0, %v2124_v63  ;;  %v2142_v63 = vld [vmem:[#allocation14 + $0x260] sm:$0xff]  ;;  %v2143_v0 = vld [vmem:[#allocation14 + $0x268] sm:$0xff] }
 0x411   : > { %3164 = vmatprep.subr.bf16.mxu1 %v3163_v23  ;;  %v2108_v23 = vld [vmem:[#allocation14 + $0x150] sm:$0xff] }
 0x412   : > { %v3229_v5 = vpack.c.bf16 %v2109_v2, %v2108_v23  ;;  %v3265_v23 = vpack.c.bf16 %v2143_v0, %v2142_v63 }
 0x414   : > { %3166 = vmatpush1.bf16.msra.mxu1 %v3165_v6  ;;  %v1570_v6 = vsub.s32 2, %v4117_v12 }
 0x415   : > { %3168 = vmatprep.subr.bf16.mxu1 %v3167_v7  ;;  %v3231_v7 = vpack.c.bf16 %v2127_v4, %v2126_v3  ;;  %v2144_v3 = vld [vmem:[#allocation14 + $0x270] sm:$0xff]  ;;  %v2145_v4 = vld [vmem:[#allocation14 + $0x278] sm:$0xff] }
 0x418   : > { %3170 = vmatpush1.bf16.msra.mxu1 %v3169_v13  ;;  %v3233_v13 = vpack.c.bf16 %v2111_v9, %v2110_v8 }
 0x419   : > { %3172 = vmatprep.subr.bf16.mxu1 %v3171_v14  ;;  %v1571_v14 = vrot.slane %v4210_v19, %v1570_v6  ;;  %v1578_v6 = vsub.s32 4, %v4117_v12 }
 0x41b   : > { %v1579_v8 = vrot.slane %v4210_v19, %v1578_v6 }
 0x41c   : > { %3174 = vmatpush1.bf16.msra.mxu1 %v3173_v17  ;;  %v2113_v17 = vld [vmem:[#allocation14 + $0x178] sm:$0xff] }
 0x41d   : > { %v3237_v25 = vpack.c.bf16 %v2113_v17, %v2112_v16 }
 0x41f   : > { %2054 = vmatmul.mubr.f32.vlgmr.msra.gmra.mrb[6].mxu1 %v4195_v26 }
 0x472   : > { %v1771_v22 = vpop.f32.mrb[4].mxu1  ;;  %v4217_v30 = vpop.f32.mrb[6].mxu0 }
 0x473   : > { %v3275_v31 = vadd.f32 %v1771_v22, %v1563_v27  ;;  %v1773_v32 = vpop.f32.mrb[5].mxu1  ;;  %v1915_v26 = vpop.f32.mrb[7].mxu0  ;;  %v3277_v27 = vadd.f32 %v4217_v30, %v1571_v14  ;;  %v2131_v22 = vld [vmem:[#allocation14 + $0x208] sm:$0xff]  ;;  %v3247_v30 = vpack.c.bf16 %v2151_v38, %v2150_v37 }
 0x474   : > { %v3276_v35 = vadd.f32 %v1773_v32, %v1567_v28  ;;  %v3278_v36 = vadd.f32 %v1915_v26, %v1575_v29  ;;  %v3239_v28 = vpack.c.bf16 %v2147_v24, %v2146_v18  ;;  %v2130_v29 = vld [vmem:[#allocation14 + $0x200] sm:$0xff]  ;;  %v2149_v32 = vld [vmem:[#allocation14 + $0x298] sm:$0xff] }
 0x475   : > { %v2060_v41 = vmax.f32 %v3275_v31, 0.0  ;;  %v2148_v31 = vld [vmem:[#allocation14 + $0x290] sm:$0xff]  ;;  %v3241_v26 = vpack.c.bf16 %v2131_v22, %v2130_v29  ;;  %v2062_v33 = vmax.f32 %v3277_v27, 0.0 }
 0x476   : > { %v2061_v39 = vmax.f32 %v3276_v35, 0.0  ;;  %v2063_v45 = vmax.f32 %v3278_v36, 0.0  ;;  %v3243_v34 = vpack.c.bf16 %v2149_v32, %v2148_v31  ;;  %v2132_v35 = vld [vmem:[#allocation14 + $0x210] sm:$0xff]  ;;  %v2133_v36 = vld [vmem:[#allocation14 + $0x218] sm:$0xff] }
 0x478   : > { %2233 = vmatprep.mubr.f32.mxu0 %v2061_v39  ;;  %v3245_v39 = vpack.c.bf16 %v2133_v36, %v2132_v35 }
 0x479   : > { %2234 = vmatmul.mubr.f32.vlgmr.msra.gmra.mrb[8].mxu0 %v2060_v41  ;;  %v2135_v41 = vld [vmem:[#allocation14 + $0x228] sm:$0xff] }
 0x47a   : > { %3210 = vmatpush3.bf16.msra.mxu0 %v3209_v40  ;;  %2303 = vmatprep.mubr.f32.mxu0 %v2063_v45  ;;  %v2134_v40 = vld [vmem:[#allocation14 + $0x220] sm:$0xff] }
 0x47b   : > { %3212 = vmatprep.subr.bf16.mxu0 %v3211_v42  ;;  %v2152_v42 = vld [vmem:[#allocation14 + $0x2b0] sm:$0xff]  ;;  %v3249_v44 = vpack.c.bf16 %v2135_v41, %v2134_v40 }
 0x47c   : > { %v3251_v45 = vpack.c.bf16 %v2153_v43, %v2152_v42 }
 0x47e   : > { %3214 = vmatpush3.bf16.msra.mxu0 %v3213_v48  ;;  %v2154_v48 = vld [vmem:[#allocation14 + $0x2c0] sm:$0xff] }
 0x47f   : > { %3216 = vmatprep.subr.bf16.mxu0 %v3215_v49  ;;  %v2155_v49 = vld [vmem:[#allocation14 + $0x2c8] sm:$0xff] }
 0x480   : > { %v3255_v51 = vpack.c.bf16 %v2155_v49, %v2154_v48 }
 0x482   : > { %3218 = vmatpush3.bf16.msra.mxu0 %v3217_v54  ;;  %v2156_v54 = vld [vmem:[#allocation14 + $0x2d0] sm:$0xff] }
 0x483   : > { %3220 = vmatprep.subr.bf16.mxu0 %v3219_v55  ;;  %v2157_v55 = vld [vmem:[#allocation14 + $0x2d8] sm:$0xff] }
 0x484   : > { %v3259_v56 = vpack.c.bf16 %v2157_v55, %v2156_v54 }
 0x486   : > { %3222 = vmatpush3.bf16.msra.mxu0 %v3221_v59  ;;  %v2158_v59 = vld [vmem:[#allocation14 + $0x2e0] sm:$0xff] }
 0x487   : > { %3224 = vmatprep.subr.bf16.mxu0 %v3223_v60  ;;  %v2159_v60 = vld [vmem:[#allocation14 + $0x2e8] sm:$0xff] }
 0x488   : > { %v3263_v62 = vpack.c.bf16 %v2159_v60, %v2158_v59 }
 0x48a   : > { %3226 = vmatpush3.bf16.msra.mxu0 %v3225_v20  ;;  %v2160_v20 = vld [vmem:[#allocation14 + $0x2f0] sm:$0xff] }
 0x48b   : > { %3228 = vmatprep.subr.bf16.mxu0 %v3227_v1  ;;  %v2161_v1 = vld [vmem:[#allocation14 + $0x2f8] sm:$0xff] }
 0x48c   : > { %v3267_v2 = vpack.c.bf16 %v2161_v1, %v2160_v20 }
 0x48e   : > { %3230 = vmatpush3.bf16.msra.mxu0 %v3229_v5  ;;  %v3269_v5 = vpack.c.bf16 %v2145_v4, %v2144_v3 }
 0x48f   : > { %3232 = vmatprep.subr.bf16.mxu0 %v3231_v7  ;;  %v1582_v7 = vsub.s32 5, %v4117_v12 }
 0x491   : > { %v1583_v9 = vrot.slane %v4210_v19, %v1582_v7 }
 0x492   : > { %3234 = vmatpush3.bf16.msra.mxu0 %v3233_v13 }
 0x493   : > { %3236 = vmatprep.subr.bf16.mxu0 %v3235_v15 }
 0x496   : > { %3238 = vmatpush3.bf16.msra.mxu0 %v3237_v25  ;;  %v2569_v25 = vld [vmem:[#allocation15] ss:$0 sm:$0xff] }
 0x497   : > { %3240 = vmatprep.subr.bf16.mxu0 %v3239_v28 }
 0x499   : > { %2304 = vmatmul.mubr.f32.vlgmr.msra.gmra.mrb[10].mxu0 %v2062_v33 }
 0x49a   : > { %3242 = vmatpush3.bf16.msra.mxu0 %v3241_v26 }
 0x49b   : > { %3244 = vmatprep.subr.bf16.mxu0 %v3243_v34 }
 0x49e   : > { %3246 = vmatpush3.bf16.msra.mxu0 %v3245_v39 }
 0x49f   : > { %3248 = vmatprep.subr.bf16.mxu0 %v3247_v30 }
 0x4a2   : > { %3250 = vmatpush3.bf16.msra.mxu0 %v3249_v44 }
 0x4a3   : > { %3252 = vmatprep.subr.bf16.mxu0 %v3251_v45 }
 0x4a6   : > { %3254 = vmatpush3.bf16.msra.mxu0 %v3253_v50 }
 0x4a7   : > { %3256 = vmatprep.subr.bf16.mxu0 %v3255_v51 }
 0x4aa   : > { %3258 = vmatpush3.bf16.msra.mxu0 %v3257_v21 }
 0x4ab   : > { %3260 = vmatprep.subr.bf16.mxu0 %v3259_v56 }
 0x4ae   : > { %3262 = vmatpush3.bf16.msra.mxu0 %v3261_v61 }
 0x4af   : > { %3264 = vmatprep.subr.bf16.mxu0 %v3263_v62 }
 0x4b2   : > { %3266 = vmatpush3.bf16.msra.mxu0 %v3265_v23 }
 0x4b3   : > { %3268 = vmatprep.subr.bf16.mxu0 %v3267_v2 }
 0x4b6   : > { %3270 = vmatpush3.bf16.msra.mxu0 %v3269_v5 }
 0x4f2   : > { %v2055_v10 = vpop.f32.mrb[6].mxu1 }
 0x4f3   : > { %v3279_v11 = vadd.f32 %v2055_v10, %v1579_v8  ;;  %v2057_v13 = vpop.f32.mrb[7].mxu1 }
 0x4f4   : > { %v3280_v14 = vadd.f32 %v2057_v13, %v1583_v9 }
 0x4f5   : > { %v2064_v16 = vmax.f32 %v3279_v11, 0.0 }
 0x4f6   : > { %v2065_v15 = vmax.f32 %v3280_v14, 0.0 }
 0x4f8   : > { %2373 = vmatprep.mubr.f32.mxu0 %v2065_v15 }
 0x4f9   : > { %2374 = vmatmul.mubr.f32.vlgmr.msra.gmra.mrb[12].mxu0 %v2064_v16 }
 0x54c   : > { %v2635_v17 = vpop.f32.mrb[8].mxu0 }
 0x54d   : > { %v2636_v18 = vpop.f32.mrb[9].mxu0 }
 0x54e   : > { %v2637_v24 = vadd.f32 %v2636_v18, %v2635_v17 }
 0x550   : > { %v2236_v28 = vadd.f32 %v2637_v24, %v2569_v25 }
 0x56c   : > { %v2670_v27 = vpop.f32.mrb[10].mxu0 }
 0x56d   : > { %v2671_v12 = vpop.f32.mrb[11].mxu0 }
 0x56e   : > { %v2672_v29 = vadd.f32 %v2671_v12, %v2670_v27 }
 0x570   : > { %v2306_v19 = vadd.f32 %v2672_v29, %v2236_v28 }
 0x5cc   : > { %v2705_v22 = vpop.f32.mrb[12].mxu0 }
 0x5cd   : > { %v2706_v31 = vpop.f32.mrb[13].mxu0 }
 0x5ce   : > { %v2707_v32 = vadd.f32 %v2706_v31, %v2705_v22 }
 0x5d0   : > { %v2376_v26 = vadd.f32 %v2707_v32, %v2306_v19 }
 0x5d2   : > { %2379 = vst [vmem:[%s442_s16] sm:$0xff] %v2376_v26 }
 0x5d3   : > { %3664 = shalt.err (!%p3661_p4)
}
 0x5d4   : > { %s3665_s20 = scalar_lea.hbm %s4231_s29, 128  ;;  %s3669_s14 = scalar_lea.hbm %s4284_s9, 256 }
 0x5d5   : > { %p3666_p11 = scmp.ne.s32.totalorder %s4231_s29, %s3665_s20  ;;  %p3670_p9 = scmp.lt.u32.totalorder %s4231_s29, %s4284_s9 }
 0x5d6   : > { %p3671_p7 = scmp.lt.u32.totalorder %s3669_s14, %s3665_s20  ;;  %p3673_p12 = scmp.lt.u32.totalorder %s3665_s20, %s4231_s29 }
 0x5d7   : > { %p3667_p0 = pnand %p3666_p11, %p4307_p13 }
 0x5d8   : > { %p3672_p10 = por %p3671_p7, %p3670_p9 }
 0x5d9   : > { %p3668_p5 = pneg %p3667_p0 }
 0x5da   : > { %p3674_p1 = por %p3673_p12, %p3672_p10 }
 0x5dc   : > { %p3675_p3 = pnand %p3674_p1, %p3668_p5 }
 0x5de   : > { %3678 = shalt.err (!%p3675_p3)
}
 0x5df   : > { %3317 = dma.vmem_to_hbm [thread:$0]  (%p4307_p13), %s4233_s13, 128, %s4231_s29, %s2381_s22  }
 0x5e0 PF: > { %s2406_s2 = sand.u32 1, %s3721_s30   ;;  %p4308_p2 = scmp.ne.s32.totalorder %s4296_s19, 0 }
 0x5e1   : > { %p4309_p8 = scmp.ge.s32.totalorder %s3733_s12, 2  ;;  %s2407_s27 = scalar_lea.sflag [#allocation5], %s2406_s2 }
 0x5e3   : > { %p3346_p6 = pnand %p4309_p8, %p4308_p2 }
 0x5e5   : > { %3716 = dma.done.wait (!%p3346_p6), %s2407_s27, 128  }
 0x5e6   : > { %3718 = vsyncadd (!%p3346_p6), %s2407_s27, 4294967168  ;;  %p26_p4 = scmp.ge.s32.totalorder %s4000_s21, 4   ;;  %s4310_s30 = smov %s3725_s10 }
 0x5e7   : > { %s4311_s10 = smov %s3729_s11  ;;  %s4312_s11 = smov %s4012_s28 }
 0x5e8   : > { %s4313_s12 = smov %s4000_s21  ;;  %28 = sbr.rel (!%p26_p4) target bundleno = 11 (0xb), region = 129 }
 0x5ef   :  { %2412 = vsyncpa [#allocation4], 1 }
 0x5f0   :  { %2414 = vsyncpa [#allocation4 + $0x1], 1 }
 0x5f1   :  { %2415 = vsyncpa [#allocation7], 1 }
 0x5f2   :  { %2416 = vsyncpa [#allocation10], 1 }
 0x5f3   :  { %2417 = vsyncpa [#allocation13], 1 }
 0x5f4   :  { %2418 = vsyncpa [#allocation16], 1 }
 0x5f5   :  { %2419 = vsyncpa [#allocation5], 1 }
 0x5f6   :  { %2421 = vsyncpa [#allocation5 + $0x1], 1 }

</bundles_post_ra>
